<compile_context>
chip_gen: v5e
topology: v5e:2x2
jax: 0.10.0
libtpu: 0.0.40
codegen_flags: <defaults>
</compile_context>

<pallas_src>
import functools
import math

import jax
import jax.numpy as jnp
from jax.experimental import pallas as pl
from jax.experimental.pallas import tpu as pltpu

# tile-size targets (re-derived per call against the actual dims; see _pick_tile)
TM_TARGET = 256     # rows of (B*S) per block
TN_TARGET = 256     # output-feature lanes per block (128-aligned)
TK_TARGET = 512     # reduction depth per block (128-aligned)
TQ_TARGET = 128     # flash-attention query block
TKV_TARGET = 128    # flash-attention kv block


def _pick_tile(dim, target, align):
    """Largest multiple of `align` <= target that evenly divides `dim`, else full dim."""
    if dim % align != 0:
        return dim
    t = max(align, (min(target, dim) // align) * align)
    while dim % t != 0:
        t -= align
    return t


# --------------------- tiled matmul (+ bias, + activation) -------------------

def _matmul_kernel(x_ref, w_ref, b_ref, o_ref, acc_ref, *, activation):
    @pl.when(pl.program_id(2) == 0)
    def _():
        acc_ref[...] = jnp.zeros_like(acc_ref)

    acc_ref[...] += jnp.dot(
        x_ref[...].astype(jnp.bfloat16), w_ref[...].astype(jnp.bfloat16),
        preferred_element_type=jnp.float32)

    @pl.when(pl.program_id(2) == pl.num_programs(2) - 1)
    def _():
        y = acc_ref[...] + b_ref[...]
        if activation == "relu":
            y = jnp.maximum(y, 0.0)
        elif activation == "gelu":
            y = jax.nn.gelu(y, approximate=True)   # tanh form -> EUP slot
        o_ref[...] = y.astype(o_ref.dtype)


def matmul(x, w, b, activation=None, out_dtype=jnp.float32):
    M, K = x.shape
    K2, N = w.shape
    assert K == K2
    tm = _pick_tile(M, TM_TARGET, 8)
    tn = _pick_tile(N, TN_TARGET, 128)
    tk = _pick_tile(K, TK_TARGET, 128)
    grid = (M // tm, N // tn, K // tk)
    return pl.pallas_call(
        functools.partial(_matmul_kernel, activation=activation),
        out_shape=jax.ShapeDtypeStruct((M, N), out_dtype),
        grid_spec=pltpu.PrefetchScalarGridSpec(
            num_scalar_prefetch=0,
            grid=grid,
            in_specs=[
                pl.BlockSpec((tm, tk), lambda i, j, k: (i, k)),
                pl.BlockSpec((tk, tn), lambda i, j, k: (k, j)),
                pl.BlockSpec((1, tn), lambda i, j, k: (0, j)),
            ],
            out_specs=pl.BlockSpec((tm, tn), lambda i, j, k: (i, j)),
            scratch_shapes=[pltpu.VMEM((tm, tn), jnp.float32)],
        ),
        compiler_params=pltpu.CompilerParams(
            dimension_semantics=("parallel", "parallel", "arbitrary")),
    )(x, w, b)


# -------------- tiled matmul + bias + residual + LayerNorm epilogue ----------

def _matmul_add_ln_kernel(x_ref, w_ref, b_ref, r_ref, g_ref, beta_ref,
                          o_ref, acc_ref, *, eps):
    @pl.when(pl.program_id(1) == 0)
    def _():
        acc_ref[...] = jnp.zeros_like(acc_ref)

    acc_ref[...] += jnp.dot(
        x_ref[...].astype(jnp.bfloat16), w_ref[...].astype(jnp.bfloat16),
        preferred_element_type=jnp.float32)

    @pl.when(pl.program_id(1) == pl.num_programs(1) - 1)
    def _():
        y = acc_ref[...] + b_ref[...] + r_ref[...]
        mu = jnp.mean(y, axis=-1, keepdims=True)
        var = jnp.mean(jnp.square(y - mu), axis=-1, keepdims=True)
        y = (y - mu) * jax.lax.rsqrt(var + eps)
        o_ref[...] = (y * g_ref[...] + beta_ref[...]).astype(o_ref.dtype)


def matmul_add_layer_norm(x, w, b, resid, gamma, beta, eps=1e-12):
    # LayerNorm is over the full output-feature axis, so N is kept un-tiled.
    M, K = x.shape
    _, N = w.shape
    tm = _pick_tile(M, TM_TARGET, 8)
    tk = _pick_tile(K, TK_TARGET, 128)
    grid = (M // tm, K // tk)
    return pl.pallas_call(
        functools.partial(_matmul_add_ln_kernel, eps=eps),
        out_shape=jax.ShapeDtypeStruct((M, N), jnp.float32),
        grid_spec=pltpu.PrefetchScalarGridSpec(
            num_scalar_prefetch=0,
            grid=grid,
            in_specs=[
                pl.BlockSpec((tm, tk), lambda i, k: (i, k)),
                pl.BlockSpec((tk, N), lambda i, k: (k, 0)),
                pl.BlockSpec((1, N), lambda i, k: (0, 0)),
                pl.BlockSpec((tm, N), lambda i, k: (i, 0)),
                pl.BlockSpec((1, N), lambda i, k: (0, 0)),
                pl.BlockSpec((1, N), lambda i, k: (0, 0)),
            ],
            out_specs=pl.BlockSpec((tm, N), lambda i, k: (i, 0)),
            scratch_shapes=[pltpu.VMEM((tm, N), jnp.float32)],
        ),
        compiler_params=pltpu.CompilerParams(
            dimension_semantics=("parallel", "arbitrary")),
    )(x, w, b, resid, gamma, beta)


# ------------------------------ plain LayerNorm ------------------------------

def _layer_norm_kernel(x_ref, g_ref, b_ref, o_ref, *, eps):
    x = x_ref[...]
    mu = jnp.mean(x, axis=-1, keepdims=True)
    var = jnp.mean(jnp.square(x - mu), axis=-1, keepdims=True)
    o_ref[...] = ((x - mu) * jax.lax.rsqrt(var + eps) * g_ref[...]
                  + b_ref[...]).astype(o_ref.dtype)


def layer_norm(x, gamma, beta, eps=1e-12):
    M, N = x.shape
    tm = _pick_tile(M, TM_TARGET, 8)
    return pl.pallas_call(
        functools.partial(_layer_norm_kernel, eps=eps),
        out_shape=jax.ShapeDtypeStruct((M, N), jnp.float32),
        grid_spec=pltpu.PrefetchScalarGridSpec(
            num_scalar_prefetch=0,
            grid=(M // tm,),
            in_specs=[
                pl.BlockSpec((tm, N), lambda i: (i, 0)),
                pl.BlockSpec((1, N), lambda i: (0, 0)),
                pl.BlockSpec((1, N), lambda i: (0, 0)),
            ],
            out_specs=pl.BlockSpec((tm, N), lambda i: (i, 0)),
        ),
        compiler_params=pltpu.CompilerParams(dimension_semantics=("parallel",)),
    )(x, gamma, beta)


# --------------------------- flash-style attention ---------------------------

def _flash_attn_kernel(bias_ref, q_ref, k_ref, v_ref, o_ref, m_sc, l_sc, acc_sc):
    ki = pl.program_id(3)

    @pl.when(ki == 0)
    def _():
        m_sc[...] = jnp.full_like(m_sc, -1e30)
        l_sc[...] = jnp.zeros_like(l_sc)
        acc_sc[...] = jnp.zeros_like(acc_sc)

    q = q_ref[0, 0]                      # (tq, dH) bf16 (Wq already pre-scaled)
    k = k_ref[0, 0]                      # (tkv, dH) bf16
    s = jax.lax.dot_general(q, k, (((1,), (1,)), ((), ())),
                            preferred_element_type=jnp.float32)
    s = s + bias_ref[0]                  # (1, tkv) additive key-padding bias

    m_prev = m_sc[...]
    m_new = jnp.maximum(m_prev, jnp.max(s, axis=-1, keepdims=True))
    alpha = jnp.exp(m_prev - m_new)
    p = jnp.exp(s - m_new)
    l_sc[...] = alpha * l_sc[...] + jnp.sum(p, axis=-1, keepdims=True)
    acc_sc[...] = alpha * acc_sc[...] + jnp.dot(
        p.astype(jnp.bfloat16), v_ref[0, 0], preferred_element_type=jnp.float32)
    m_sc[...] = m_new

    @pl.when(ki == pl.num_programs(3) - 1)
    def _():
        o_ref[0, 0] = (acc_sc[...] * pl.reciprocal(l_sc[...], approx=True)
                       ).astype(o_ref.dtype)


def flash_attention(q, k, v, key_bias):
    B, nh, S, dH = q.shape
    tq = _pick_tile(S, TQ_TARGET, 8)
    tkv = _pick_tile(S, TKV_TARGET, 128)
    grid = (B, nh, S // tq, S // tkv)
    return pl.pallas_call(
        _flash_attn_kernel,
        out_shape=jax.ShapeDtypeStruct((B, nh, S, dH), jnp.bfloat16),
        grid_spec=pltpu.PrefetchScalarGridSpec(
            num_scalar_prefetch=0,
            grid=grid,
            in_specs=[
                pl.BlockSpec((1, 1, tkv), lambda b, h, qi, ki: (b, 0, ki)),
                pl.BlockSpec((1, 1, tq, dH), lambda b, h, qi, ki: (b, h, qi, 0)),
                pl.BlockSpec((1, 1, tkv, dH), lambda b, h, qi, ki: (b, h, ki, 0)),
                pl.BlockSpec((1, 1, tkv, dH), lambda b, h, qi, ki: (b, h, ki, 0)),
            ],
            out_specs=pl.BlockSpec((1, 1, tq, dH), lambda b, h, qi, ki: (b, h, qi, 0)),
            scratch_shapes=[
                pltpu.VMEM((tq, 1), jnp.float32),
                pltpu.VMEM((tq, 1), jnp.float32),
                pltpu.VMEM((tq, dH), jnp.float32),
            ],
        ),
        compiler_params=pltpu.CompilerParams(
            dimension_semantics=("parallel", "parallel", "parallel", "arbitrary")),
    )(key_bias, q, k, v)


# --------------------------- fused regression head ---------------------------

def _regression_head_kernel(x_ref, w1_ref, b1_ref, w2_ref, b2_ref, o_ref):
    h = jnp.dot(x_ref[...].astype(jnp.bfloat16), w1_ref[...].astype(jnp.bfloat16),
                preferred_element_type=jnp.float32) + b1_ref[...]
    h = jnp.maximum(h, 0.0)                      # ReLU
    # nn.Dropout(0.1) is identity at inference.
    # TODO(synk): training-mode dropout (pltpu.prng_random_bits mask) not implemented.
    y = jnp.dot(h.astype(jnp.bfloat16), w2_ref[...].astype(jnp.bfloat16),
                preferred_element_type=jnp.float32) + b2_ref[...]
    o_ref[...] = y.astype(o_ref.dtype)


def regression_head(pooled, w1, b1, w2_padded, b2_padded):
    B, H = pooled.shape
    Hm = w1.shape[1]            # 256
    NP = w2_padded.shape[1]     # 128 (lane-dense padded N; real output is column 0)
    tb = _pick_tile(B, TM_TARGET, 8)
    return pl.pallas_call(
        _regression_head_kernel,
        out_shape=jax.ShapeDtypeStruct((B, NP), jnp.float32),
        grid_spec=pltpu.PrefetchScalarGridSpec(
            num_scalar_prefetch=0,
            grid=(B // tb,),
            in_specs=[
                pl.BlockSpec((tb, H), lambda i: (i, 0)),
                pl.BlockSpec((H, Hm), lambda i: (0, 0)),
                pl.BlockSpec((1, Hm), lambda i: (0, 0)),
                pl.BlockSpec((Hm, NP), lambda i: (0, 0)),
                pl.BlockSpec((1, NP), lambda i: (0, 0)),
            ],
            out_specs=pl.BlockSpec((tb, NP), lambda i: (i, 0)),
        ),
        compiler_params=pltpu.CompilerParams(dimension_semantics=("parallel",)),
    )(pooled, w1, b1, w2_padded, b2_padded)


# -------------------------------- parameters ---------------------------------

def init_params(key, vocab, max_seq, hidden, ffn):
    ks = jax.random.split(key, 12)

    def w(k, shape, scale=0.02):
        return (scale * jax.random.normal(k, shape)).astype(jnp.float32)

    zeros = lambda n: jnp.zeros((1, n), jnp.float32)
    ones = lambda n: jnp.ones((1, n), jnp.float32)

    return {
        # synthetic backbone ("self.mlm")
        "word_emb": w(ks[0], (vocab, hidden)),
        "pos_emb": w(ks[1], (max_seq, hidden)),
        "emb_ln_g": ones(hidden), "emb_ln_b": zeros(hidden),
        "wq": w(ks[2], (hidden, hidden)), "bq": zeros(hidden),
        "wk": w(ks[3], (hidden, hidden)), "bk": zeros(hidden),
        "wv": w(ks[4], (hidden, hidden)), "bv": zeros(hidden),
        "wo": w(ks[5], (hidden, hidden)), "bo": zeros(hidden),
        "ln1_g": ones(hidden), "ln1_b": zeros(hidden),
        "w_ffn1": w(ks[6], (hidden, ffn)), "b_ffn1": zeros(ffn),
        "w_ffn2": w(ks[7], (ffn, hidden)), "b_ffn2": zeros(hidden),
        "ln2_g": ones(hidden), "ln2_b": zeros(hidden),
        # regression head: Linear(hidden,256) -> ReLU -> Dropout -> Linear(256,1)
        "w_reg1": w(ks[8], (hidden, 256)), "b_reg1": zeros(256),
        "w_reg2": w(ks[9], (256, 1)), "b_reg2": zeros(1),
    }


def prepare_inference_params(params, heads):
    """Fuse QKV (with 1/sqrt(dH) folded into Wq), cast matmul weights to bf16,
    pad the final (256,1) projection to a lane-dense (256,128)."""
    H = params["word_emb"].shape[1]
    dH = H // heads
    scale = 1.0 / math.sqrt(dH)
    bf16 = jnp.bfloat16
    w_qkv = jnp.concatenate(
        [params["wq"] * scale, params["wk"], params["wv"]], axis=1).astype(bf16)
    b_qkv = jnp.concatenate(
        [params["bq"] * scale, params["bk"], params["bv"]], axis=1)
    return {
        "word_emb": params["word_emb"], "pos_emb": params["pos_emb"],
        "emb_ln_g": params["emb_ln_g"], "emb_ln_b": params["emb_ln_b"],
        "w_qkv": w_qkv, "b_qkv": b_qkv,
        "wo": params["wo"].astype(bf16), "bo": params["bo"],
        "ln1_g": params["ln1_g"], "ln1_b": params["ln1_b"],
        "w_ffn1": params["w_ffn1"].astype(bf16), "b_ffn1": params["b_ffn1"],
        "w_ffn2": params["w_ffn2"].astype(bf16), "b_ffn2": params["b_ffn2"],
        "ln2_g": params["ln2_g"], "ln2_b": params["ln2_b"],
        "w_reg1": params["w_reg1"].astype(bf16), "b_reg1": params["b_reg1"],
        "w_reg2": jnp.pad(params["w_reg2"], ((0, 0), (0, 127))).astype(bf16),
        "b_reg2": jnp.pad(params["b_reg2"], ((0, 0), (0, 127))),
    }


# ---------------------------------- forward ----------------------------------

def mlm_with_regression_head(params, input_ids, attention_mask, *, heads):
    B, S = input_ids.shape
    H = params["word_emb"].shape[1]
    dH = H // heads

    # --- backbone: embeddings (gather = XLA glue) + one encoder layer ---
    emb = params["word_emb"][input_ids] + params["pos_emb"][:S][None, :, :]
    x0 = layer_norm(emb.reshape(B * S, H).astype(jnp.float32),
                    params["emb_ln_g"], params["emb_ln_b"])

    # fused Q/K/V projection: single (H, 3H) bf16 matmul
    qkv = matmul(x0, params["w_qkv"], params["b_qkv"], out_dtype=jnp.bfloat16)
    qkv = qkv.reshape(B, S, 3, heads, dH).transpose(2, 0, 3, 1, 4)  # (3,B,nh,S,dH)
    q, k, v = qkv[0], qkv[1], qkv[2]

    # additive key-padding bias from the (B, S) mask — no (B*heads, S, S) tensor
    key_bias = ((1.0 - attention_mask.astype(jnp.float32)) * -1e9).reshape(B, 1, S)

    attn = flash_attention(q, k, v, key_bias)                       # (B,nh,S,dH) bf16
    attn2d = attn.transpose(0, 2, 1, 3).reshape(B * S, H)

    # output projection with fused residual + LayerNorm epilogue
    x1 = matmul_add_layer_norm(attn2d, params["wo"], params["bo"],
                               x0, params["ln1_g"], params["ln1_b"])

    # FFN: gelu fused into matmul 1; residual + LayerNorm fused into matmul 2
    h = matmul(x1, params["w_ffn1"], params["b_ffn1"],
               activation="gelu", out_dtype=jnp.bfloat16)
    x2 = matmul_add_layer_norm(h, params["w_ffn2"], params["b_ffn2"],
                               x1, params["ln2_g"], params["ln2_b"])

    last_hidden_state = x2.reshape(B, S, H)

    # --- regression head (single fused kernel, lane-dense padded output) ---
    pooled = last_hidden_state[:, 0, :]                             # [CLS], (B, H)
    out = regression_head(pooled, params["w_reg1"], params["b_reg1"],
                          params["w_reg2"], params["b_reg2"])       # (B, 128)
    return out[:, 0]                                                # (B,)


# ------------------------------------ main ------------------------------------

if __name__ == "__main__":
    B, S = 2, 8
    VOCAB, MAX_SEQ, HIDDEN, HEADS, FFN = 100, 16, 32, 4, 64

    root = jax.random.PRNGKey(0)
    k_param, k_ids = jax.random.split(root)

    raw_params = init_params(k_param, vocab=VOCAB, max_seq=MAX_SEQ,
                             hidden=HIDDEN, ffn=FFN)
    params = prepare_inference_params(raw_params, heads=HEADS)

    input_ids = jax.random.randint(k_ids, (B, S), 0, VOCAB, dtype=jnp.int32)
    attention_mask = jnp.ones((B, S), dtype=jnp.int32).at[1, -2:].set(0)  # pad last 2 of row 1

    fwd = jax.jit(functools.partial(mlm_with_regression_head, heads=HEADS))
    out = fwd(params, input_ids, attention_mask)
    out = jax.block_until_ready(out)

    assert out.shape == (B,), out.shape
    assert out.dtype == jnp.float32
    assert bool(jnp.all(jnp.isfinite(out)))
    print("KERNEL_OK")
</pallas_src>

<mosaic_0001>
module attributes {stable_mosaic.version = 11 : i64} {
  func.func @_matmul_kernel(%arg0: i32, %arg1: i32, %arg2: i32, %arg3: memref<16x32xf32, #tpu.memory_space<vmem>>, %arg4: memref<32x96xbf16, #tpu.memory_space<vmem>>, %arg5: memref<1x96xf32, #tpu.memory_space<vmem>>, %arg6: memref<16x96xbf16, #tpu.memory_space<vmem>>, %arg7: memref<16x96xf32, #tpu.memory_space<vmem>>) attributes {dimension_semantics = [#tpu.dimension_semantics<parallel>, #tpu.dimension_semantics<parallel>, #tpu.dimension_semantics<arbitrary>], iteration_bounds = array<i64: 1, 1, 1>, scalar_prefetch = 0 : i64, scratch_operands = 1 : i64, tpu.core_type = #tpu.core_type<tc>, window_params = [{transform_indices = @transform_0, window_bounds = array<i64: 16, 32>}, {transform_indices = @transform_1, window_bounds = array<i64: 32, 96>}, {transform_indices = @transform_2, window_bounds = array<i64: 1, 96>}, {transform_indices = @transform_3, window_bounds = array<i64: 16, 96>}]} {
    %c0_i32 = arith.constant 0 : i32
    %0 = arith.cmpi eq, %arg2, %c0_i32 : i32
    %1 = arith.extui %0 : i1 to i32
    %c0_i32_0 = arith.constant 0 : i32
    %2 = arith.cmpi ne, %1, %c0_i32_0 : i32
    scf.if %2 {
      %cst_10 = arith.constant 0.000000e+00 : f32
      %13 = vector.broadcast %cst_10 : f32 to vector<16x96xf32>
      %c0_11 = arith.constant 0 : index
      %c0_12 = arith.constant 0 : index
      %14 = vector.load %arg7[%c0_11, %c0_12] : memref<16x96xf32, #tpu.memory_space<vmem>>, vector<16x96xf32>
      tpu.vector_store %arg7[%c0_11, %c0_12], %13 {strides = array<i32>} : memref<16x96xf32, #tpu.memory_space<vmem>>, vector<16x96xf32>,
    } else {
    }
    %c0 = arith.constant 0 : index
    %c0_1 = arith.constant 0 : index
    %3 = vector.load %arg7[%c0, %c0_1] : memref<16x96xf32, #tpu.memory_space<vmem>>, vector<16x96xf32>
    %c0_2 = arith.constant 0 : index
    %c0_3 = arith.constant 0 : index
    %4 = vector.load %arg3[%c0_2, %c0_3] : memref<16x32xf32, #tpu.memory_space<vmem>>, vector<16x32xf32>
    %5 = arith.truncf %4 : vector<16x32xf32> to vector<16x32xbf16>
    %c0_4 = arith.constant 0 : index
    %c0_5 = arith.constant 0 : index
    %6 = vector.load %arg4[%c0_4, %c0_5] : memref<32x96xbf16, #tpu.memory_space<vmem>>, vector<32x96xbf16>
    %cst = arith.constant dense<0.000000e+00> : vector<16x96xf32>
    %7 = tpu.matmul %5, %6, %cst {dimension_numbers = #tpu.dot_dimension_numbers<[1], [0], [0], [1], [0, 0, 1, 1], [], []>} : vector<16x32xbf16>, vector<32x96xbf16>, vector<16x96xf32> -> vector<16x96xf32>
    %8 = arith.addf %3, %7 : vector<16x96xf32>
    %c0_6 = arith.constant 0 : index
    %c0_7 = arith.constant 0 : index
    %9 = vector.load %arg7[%c0_6, %c0_7] : memref<16x96xf32, #tpu.memory_space<vmem>>, vector<16x96xf32>
    tpu.vector_store %arg7[%c0_6, %c0_7], %8 {strides = array<i32>} : memref<16x96xf32, #tpu.memory_space<vmem>>, vector<16x96xf32>,
    %c0_i32_8 = arith.constant 0 : i32
    %10 = arith.cmpi eq, %arg2, %c0_i32_8 : i32
    %11 = arith.extui %10 : i1 to i32
    %c0_i32_9 = arith.constant 0 : i32
    %12 = arith.cmpi ne, %11, %c0_i32_9 : i32
    scf.if %12 {
      %c0_10 = arith.constant 0 : index
      %c0_11 = arith.constant 0 : index
      %13 = vector.load %arg7[%c0_10, %c0_11] : memref<16x96xf32, #tpu.memory_space<vmem>>, vector<16x96xf32>
      %c0_12 = arith.constant 0 : index
      %c0_13 = arith.constant 0 : index
      %14 = vector.load %arg5[%c0_12, %c0_13] : memref<1x96xf32, #tpu.memory_space<vmem>>, vector<1x96xf32>
      %15 = vector.broadcast %14 : vector<1x96xf32> to vector<16x96xf32>
      %16 = arith.addf %13, %15 : vector<16x96xf32>
      %17 = arith.truncf %16 : vector<16x96xf32> to vector<16x96xbf16>
      %c0_14 = arith.constant 0 : index
      %c0_15 = arith.constant 0 : index
      %18 = vector.load %arg6[%c0_14, %c0_15] : memref<16x96xbf16, #tpu.memory_space<vmem>>, vector<16x96xbf16>
      tpu.vector_store %arg6[%c0_14, %c0_15], %17 {strides = array<i32>} : memref<16x96xbf16, #tpu.memory_space<vmem>>, vector<16x96xbf16>,
    } else {
    }
    return
  }
  func.func @transform_0(%arg0: i32, %arg1: i32, %arg2: i32) -> (i32, i32) {
    %c0_i32 = arith.constant 0 : i32
    return %arg0, %arg2 : i32, i32
  }
  func.func @transform_1(%arg0: i32, %arg1: i32, %arg2: i32) -> (i32, i32) {
    %c0_i32 = arith.constant 0 : i32
    return %arg2, %arg1 : i32, i32
  }
  func.func @transform_2(%arg0: i32, %arg1: i32, %arg2: i32) -> (i32, i32) {
    %c0_i32 = arith.constant 0 : i32
    %c0_i32_0 = arith.constant 0 : i32
    return %c0_i32, %arg1 : i32, i32
  }
  func.func @transform_3(%arg0: i32, %arg1: i32, %arg2: i32) -> (i32, i32) {
    %c0_i32 = arith.constant 0 : i32
    return %arg0, %arg1 : i32, i32
  }
}

module attributes {stable_mosaic.version = 11 : i64} {
  func.func @_layer_norm_kernel(%arg0: i32, %arg1: memref<16x32xf32, #tpu.memory_space<vmem>>, %arg2: memref<1x32xf32, #tpu.memory_space<vmem>>, %arg3: memref<1x32xf32, #tpu.memory_space<vmem>>, %arg4: memref<16x32xf32, #tpu.memory_space<vmem>>) attributes {dimension_semantics = [#tpu.dimension_semantics<parallel>], iteration_bounds = array<i64: 1>, scalar_prefetch = 0 : i64, scratch_operands = 0 : i64, tpu.core_type = #tpu.core_type<tc>, window_params = [{transform_indices = @transform_0, window_bounds = array<i64: 16, 32>}, {pipeline_mode = #tpu.pipeline_mode<synchronous>, transform_indices = @transform_1, window_bounds = array<i64: 1, 32>}, {pipeline_mode = #tpu.pipeline_mode<synchronous>, transform_indices = @transform_2, window_bounds = array<i64: 1, 32>}, {transform_indices = @transform_3, window_bounds = array<i64: 16, 32>}]} {
    %c0 = arith.constant 0 : index
    %c0_0 = arith.constant 0 : index
    %0 = vector.load %arg1[%c0, %c0_0] : memref<16x32xf32, #tpu.memory_space<vmem>>, vector<16x32xf32>
    %cst = arith.constant dense<0.000000e+00> : vector<16xf32>
    %1 = vector.multi_reduction <add>, %0, %cst [1] : vector<16x32xf32> to vector<16xf32>
    %2 = vector.shape_cast %1 : vector<16xf32> to vector<16x1xf32>
    %cst_1 = arith.constant 3.200000e+01 : f32
    %3 = vector.broadcast %cst_1 : f32 to vector<16x1xf32>
    %4 = arith.divf %2, %3 : vector<16x1xf32>
    %5 = vector.broadcast %4 : vector<16x1xf32> to vector<16x32xf32>
    %6 = arith.subf %0, %5 : vector<16x32xf32>
    %7 = arith.mulf %6, %6 : vector<16x32xf32>
    %cst_2 = arith.constant dense<0.000000e+00> : vector<16xf32>
    %8 = vector.multi_reduction <add>, %7, %cst_2 [1] : vector<16x32xf32> to vector<16xf32>
    %9 = vector.shape_cast %8 : vector<16xf32> to vector<16x1xf32>
    %cst_3 = arith.constant 3.200000e+01 : f32
    %10 = vector.broadcast %cst_3 : f32 to vector<16x1xf32>
    %11 = arith.divf %9, %10 : vector<16x1xf32>
    %12 = vector.broadcast %4 : vector<16x1xf32> to vector<16x32xf32>
    %13 = arith.subf %0, %12 : vector<16x32xf32>
    %cst_4 = arith.constant 9.99999996E-13 : f32
    %14 = vector.broadcast %cst_4 : f32 to vector<16x1xf32>
    %15 = arith.addf %11, %14 : vector<16x1xf32>
    %16 = math.rsqrt %15 : vector<16x1xf32>
    %17 = vector.broadcast %16 : vector<16x1xf32> to vector<16x32xf32>
    %18 = arith.mulf %13, %17 : vector<16x32xf32>
    %c0_5 = arith.constant 0 : index
    %c0_6 = arith.constant 0 : index
    %19 = vector.load %arg2[%c0_5, %c0_6] : memref<1x32xf32, #tpu.memory_space<vmem>>, vector<1x32xf32>
    %20 = vector.broadcast %19 : vector<1x32xf32> to vector<16x32xf32>
    %21 = arith.mulf %18, %20 : vector<16x32xf32>
    %c0_7 = arith.constant 0 : index
    %c0_8 = arith.constant 0 : index
    %22 = vector.load %arg3[%c0_7, %c0_8] : memref<1x32xf32, #tpu.memory_space<vmem>>, vector<1x32xf32>
    %23 = vector.broadcast %22 : vector<1x32xf32> to vector<16x32xf32>
    %24 = arith.addf %21, %23 : vector<16x32xf32>
    %c0_9 = arith.constant 0 : index
    %c0_10 = arith.constant 0 : index
    %25 = vector.load %arg4[%c0_9, %c0_10] : memref<16x32xf32, #tpu.memory_space<vmem>>, vector<16x32xf32>
    tpu.vector_store %arg4[%c0_9, %c0_10], %24 {strides = array<i32>} : memref<16x32xf32, #tpu.memory_space<vmem>>, vector<16x32xf32>,
    return
  }
  func.func @transform_0(%arg0: i32) -> (i32, i32) {
    %c0_i32 = arith.constant 0 : i32
    %c0_i32_0 = arith.constant 0 : i32
    return %arg0, %c0_i32 : i32, i32
  }
  func.func @transform_1(%arg0: i32) -> (i32, i32) {
    %c0_i32 = arith.constant 0 : i32
    %c0_i32_0 = arith.constant 0 : i32
    %c0_i32_1 = arith.constant 0 : i32
    return %c0_i32, %c0_i32_0 : i32, i32
  }
  func.func @transform_2(%arg0: i32) -> (i32, i32) {
    %c0_i32 = arith.constant 0 : i32
    %c0_i32_0 = arith.constant 0 : i32
    %c0_i32_1 = arith.constant 0 : i32
    return %c0_i32, %c0_i32_0 : i32, i32
  }
  func.func @transform_3(%arg0: i32) -> (i32, i32) {
    %c0_i32 = arith.constant 0 : i32
    %c0_i32_0 = arith.constant 0 : i32
    return %arg0, %c0_i32 : i32, i32
  }
}

module attributes {stable_mosaic.version = 11 : i64} {
  func.func @_flash_attn_kernel(%arg0: i32, %arg1: i32, %arg2: i32, %arg3: i32, %arg4: memref<1x1x8xf32, #tpu.memory_space<vmem>>, %arg5: memref<1x1x8x8xbf16, #tpu.memory_space<vmem>>, %arg6: memref<1x1x8x8xbf16, #tpu.memory_space<vmem>>, %arg7: memref<1x1x8x8xbf16, #tpu.memory_space<vmem>>, %arg8: memref<1x1x8x8xbf16, #tpu.memory_space<vmem>>, %arg9: memref<8x1xf32, #tpu.memory_space<vmem>>, %arg10: memref<8x1xf32, #tpu.memory_space<vmem>>, %arg11: memref<8x8xf32, #tpu.memory_space<vmem>>) attributes {dimension_semantics = [#tpu.dimension_semantics<parallel>, #tpu.dimension_semantics<parallel>, #tpu.dimension_semantics<parallel>, #tpu.dimension_semantics<arbitrary>], iteration_bounds = array<i64: 2, 4, 1, 1>, scalar_prefetch = 0 : i64, scratch_operands = 3 : i64, tpu.core_type = #tpu.core_type<tc>, window_params = [{transform_indices = @transform_0, window_bounds = array<i64: 1, 1, 8>}, {transform_indices = @transform_1, window_bounds = array<i64: 1, 1, 8, 8>}, {transform_indices = @transform_2, window_bounds = array<i64: 1, 1, 8, 8>}, {transform_indices = @transform_3, window_bounds = array<i64: 1, 1, 8, 8>}, {transform_indices = @transform_4, window_bounds = array<i64: 1, 1, 8, 8>}]} {
    %c0_i32 = arith.constant 0 : i32
    %0 = arith.cmpi eq, %arg3, %c0_i32 : i32
    %1 = arith.extui %0 : i1 to i32
    %c0_i32_0 = arith.constant 0 : i32
    %2 = arith.cmpi ne, %1, %c0_i32_0 : i32
    scf.if %2 {
      %cst_32 = arith.constant -1.000000e+30 : f32
      %40 = vector.broadcast %cst_32 : f32 to vector<8x1xf32>
      %c0_33 = arith.constant 0 : index
      %c0_34 = arith.constant 0 : index
      %41 = vector.load %arg9[%c0_33, %c0_34] : memref<8x1xf32, #tpu.memory_space<vmem>>, vector<8x1xf32>
      tpu.vector_store %arg9[%c0_33, %c0_34], %40 {strides = array<i32>} : memref<8x1xf32, #tpu.memory_space<vmem>>, vector<8x1xf32>,
      %cst_35 = arith.constant 0.000000e+00 : f32
      %42 = vector.broadcast %cst_35 : f32 to vector<8x1xf32>
      %c0_36 = arith.constant 0 : index
      %c0_37 = arith.constant 0 : index
      %43 = vector.load %arg10[%c0_36, %c0_37] : memref<8x1xf32, #tpu.memory_space<vmem>>, vector<8x1xf32>
      tpu.vector_store %arg10[%c0_36, %c0_37], %42 {strides = array<i32>} : memref<8x1xf32, #tpu.memory_space<vmem>>, vector<8x1xf32>,
      %cst_38 = arith.constant 0.000000e+00 : f32
      %44 = vector.broadcast %cst_38 : f32 to vector<8x8xf32>
      %c0_39 = arith.constant 0 : index
      %c0_40 = arith.constant 0 : index
      %45 = vector.load %arg11[%c0_39, %c0_40] : memref<8x8xf32, #tpu.memory_space<vmem>>, vector<8x8xf32>
      tpu.vector_store %arg11[%c0_39, %c0_40], %44 {strides = array<i32>} : memref<8x8xf32, #tpu.memory_space<vmem>>, vector<8x8xf32>,
    } else {
    }
    %c0 = arith.constant 0 : index
    %c0_1 = arith.constant 0 : index
    %c0_2 = arith.constant 0 : index
    %c0_3 = arith.constant 0 : index
    %3 = vector.load %arg5[%c0, %c0_1, %c0_2, %c0_3] : memref<1x1x8x8xbf16, #tpu.memory_space<vmem>>, vector<1x1x8x8xbf16>
    %4 = vector.shape_cast %3 : vector<1x1x8x8xbf16> to vector<8x8xbf16>
    %c0_4 = arith.constant 0 : index
    %c0_5 = arith.constant 0 : index
    %c0_6 = arith.constant 0 : index
    %c0_7 = arith.constant 0 : index
    %5 = vector.load %arg6[%c0_4, %c0_5, %c0_6, %c0_7] : memref<1x1x8x8xbf16, #tpu.memory_space<vmem>>, vector<1x1x8x8xbf16>
    %6 = vector.shape_cast %5 : vector<1x1x8x8xbf16> to vector<8x8xbf16>
    %cst = arith.constant dense<0.000000e+00> : vector<8x8xf32>
    %7 = tpu.matmul %4, %6, %cst {dimension_numbers = #tpu.dot_dimension_numbers<[1], [1], [0], [0], [0, 0, 1, 0], [], []>} : vector<8x8xbf16>, vector<8x8xbf16>, vector<8x8xf32> -> vector<8x8xf32>
    %c0_8 = arith.constant 0 : index
    %c0_9 = arith.constant 0 : index
    %c0_10 = arith.constant 0 : index
    %8 = vector.load %arg4[%c0_8, %c0_9, %c0_10] : memref<1x1x8xf32, #tpu.memory_space<vmem>>, vector<1x1x8xf32>
    %9 = vector.shape_cast %8 : vector<1x1x8xf32> to vector<1x8xf32>
    %10 = vector.broadcast %9 : vector<1x8xf32> to vector<8x8xf32>
    %11 = arith.addf %7, %10 : vector<8x8xf32>
    %c0_11 = arith.constant 0 : index
    %c0_12 = arith.constant 0 : index
    %12 = vector.load %arg9[%c0_11, %c0_12] : memref<8x1xf32, #tpu.memory_space<vmem>>, vector<8x1xf32>
    %cst_13 = arith.constant dense<0xFF800000> : vector<8xf32>
    %13 = vector.multi_reduction <maximumf>, %11, %cst_13 [1] : vector<8x8xf32> to vector<8xf32>
    %14 = vector.shape_cast %13 : vector<8xf32> to vector<8x1xf32>
    %15 = arith.maximumf %12, %14 : vector<8x1xf32>
    %16 = arith.subf %12, %15 : vector<8x1xf32>
    %17 = math.exp %16 : vector<8x1xf32>
    %18 = vector.broadcast %15 : vector<8x1xf32> to vector<8x8xf32>
    %19 = arith.subf %11, %18 : vector<8x8xf32>
    %20 = math.exp %19 : vector<8x8xf32>
    %c0_14 = arith.constant 0 : index
    %c0_15 = arith.constant 0 : index
    %21 = vector.load %arg10[%c0_14, %c0_15] : memref<8x1xf32, #tpu.memory_space<vmem>>, vector<8x1xf32>
    %22 = arith.mulf %17, %21 : vector<8x1xf32>
    %cst_16 = arith.constant dense<0.000000e+00> : vector<8xf32>
    %23 = vector.multi_reduction <add>, %20, %cst_16 [1] : vector<8x8xf32> to vector<8xf32>
    %24 = vector.shape_cast %23 : vector<8xf32> to vector<8x1xf32>
    %25 = arith.addf %22, %24 : vector<8x1xf32>
    %c0_17 = arith.constant 0 : index
    %c0_18 = arith.constant 0 : index
    %26 = vector.load %arg10[%c0_17, %c0_18] : memref<8x1xf32, #tpu.memory_space<vmem>>, vector<8x1xf32>
    tpu.vector_store %arg10[%c0_17, %c0_18], %25 {strides = array<i32>} : memref<8x1xf32, #tpu.memory_space<vmem>>, vector<8x1xf32>,
    %c0_19 = arith.constant 0 : index
    %c0_20 = arith.constant 0 : index
    %27 = vector.load %arg11[%c0_19, %c0_20] : memref<8x8xf32, #tpu.memory_space<vmem>>, vector<8x8xf32>
    %28 = vector.broadcast %17 : vector<8x1xf32> to vector<8x8xf32>
    %29 = arith.mulf %28, %27 : vector<8x8xf32>
    %30 = arith.truncf %20 : vector<8x8xf32> to vector<8x8xbf16>
    %c0_21 = arith.constant 0 : index
    %c0_22 = arith.constant 0 : index
    %c0_23 = arith.constant 0 : index
    %c0_24 = arith.constant 0 : index
    %31 = vector.load %arg7[%c0_21, %c0_22, %c0_23, %c0_24] : memref<1x1x8x8xbf16, #tpu.memory_space<vmem>>, vector<1x1x8x8xbf16>
    %32 = vector.shape_cast %31 : vector<1x1x8x8xbf16> to vector<8x8xbf16>
    %cst_25 = arith.constant dense<0.000000e+00> : vector<8x8xf32>
    %33 = tpu.matmul %30, %32, %cst_25 {dimension_numbers = #tpu.dot_dimension_numbers<[1], [0], [0], [1], [0, 0, 1, 1], [], []>} : vector<8x8xbf16>, vector<8x8xbf16>, vector<8x8xf32> -> vector<8x8xf32>
    %34 = arith.addf %29, %33 : vector<8x8xf32>
    %c0_26 = arith.constant 0 : index
    %c0_27 = arith.constant 0 : index
    %35 = vector.load %arg11[%c0_26, %c0_27] : memref<8x8xf32, #tpu.memory_space<vmem>>, vector<8x8xf32>
    tpu.vector_store %arg11[%c0_26, %c0_27], %34 {strides = array<i32>} : memref<8x8xf32, #tpu.memory_space<vmem>>, vector<8x8xf32>,
    %c0_28 = arith.constant 0 : index
    %c0_29 = arith.constant 0 : index
    %36 = vector.load %arg9[%c0_28, %c0_29] : memref<8x1xf32, #tpu.memory_space<vmem>>, vector<8x1xf32>
    tpu.vector_store %arg9[%c0_28, %c0_29], %15 {strides = array<i32>} : memref<8x1xf32, #tpu.memory_space<vmem>>, vector<8x1xf32>,
    %c0_i32_30 = arith.constant 0 : i32
    %37 = arith.cmpi eq, %arg3, %c0_i32_30 : i32
    %38 = arith.extui %37 : i1 to i32
    %c0_i32_31 = arith.constant 0 : i32
    %39 = arith.cmpi ne, %38, %c0_i32_31 : i32
    scf.if %39 {
      %c0_32 = arith.constant 0 : index
      %c0_33 = arith.constant 0 : index
      %40 = vector.load %arg11[%c0_32, %c0_33] : memref<8x8xf32, #tpu.memory_space<vmem>>, vector<8x8xf32>
      %c0_34 = arith.constant 0 : index
      %c0_35 = arith.constant 0 : index
      %41 = vector.load %arg10[%c0_34, %c0_35] : memref<8x1xf32, #tpu.memory_space<vmem>>, vector<8x1xf32>
      %42 = tpu.reciprocal %41 {approx = true} : vector<8x1xf32> -> vector<8x1xf32>
      %43 = vector.broadcast %42 : vector<8x1xf32> to vector<8x8xf32>
      %44 = arith.mulf %40, %43 : vector<8x8xf32>
      %45 = arith.truncf %44 : vector<8x8xf32> to vector<8x8xbf16>
      %c0_36 = arith.constant 0 : index
      %c0_37 = arith.constant 0 : index
      %c0_38 = arith.constant 0 : index
      %c0_39 = arith.constant 0 : index
      %46 = vector.load %arg8[%c0_36, %c0_37, %c0_38, %c0_39] : memref<1x1x8x8xbf16, #tpu.memory_space<vmem>>, vector<1x1x8x8xbf16>
      %47 = vector.shape_cast %46 : vector<1x1x8x8xbf16> to vector<8x8xbf16>
      %48 = vector.shape_cast %45 : vector<8x8xbf16> to vector<1x1x8x8xbf16>
      tpu.vector_store %arg8[%c0_36, %c0_37, %c0_38, %c0_39], %48 {strides = array<i32>} : memref<1x1x8x8xbf16, #tpu.memory_space<vmem>>, vector<1x1x8x8xbf16>,
    } else {
    }
    return
  }
  func.func @transform_0(%arg0: i32, %arg1: i32, %arg2: i32, %arg3: i32) -> (i32, i32, i32) {
    %c0_i32 = arith.constant 0 : i32
    %c0_i32_0 = arith.constant 0 : i32
    return %arg0, %c0_i32, %arg3 : i32, i32, i32
  }
  func.func @transform_1(%arg0: i32, %arg1: i32, %arg2: i32, %arg3: i32) -> (i32, i32, i32, i32) {
    %c0_i32 = arith.constant 0 : i32
    %c0_i32_0 = arith.constant 0 : i32
    return %arg0, %arg1, %arg2, %c0_i32 : i32, i32, i32, i32
  }
  func.func @transform_2(%arg0: i32, %arg1: i32, %arg2: i32, %arg3: i32) -> (i32, i32, i32, i32) {
    %c0_i32 = arith.constant 0 : i32
    %c0_i32_0 = arith.constant 0 : i32
    return %arg0, %arg1, %arg3, %c0_i32 : i32, i32, i32, i32
  }
  func.func @transform_3(%arg0: i32, %arg1: i32, %arg2: i32, %arg3: i32) -> (i32, i32, i32, i32) {
    %c0_i32 = arith.constant 0 : i32
    %c0_i32_0 = arith.constant 0 : i32
    return %arg0, %arg1, %arg3, %c0_i32 : i32, i32, i32, i32
  }
  func.func @transform_4(%arg0: i32, %arg1: i32, %arg2: i32, %arg3: i32) -> (i32, i32, i32, i32) {
    %c0_i32 = arith.constant 0 : i32
    %c0_i32_0 = arith.constant 0 : i32
    return %arg0, %arg1, %arg2, %c0_i32 : i32, i32, i32, i32
  }
}

module attributes {stable_mosaic.version = 11 : i64} {
  func.func @_matmul_add_ln_kernel(%arg0: i32, %arg1: i32, %arg2: memref<16x32xbf16, #tpu.memory_space<vmem>>, %arg3: memref<32x32xbf16, #tpu.memory_space<vmem>>, %arg4: memref<1x32xf32, #tpu.memory_space<vmem>>, %arg5: memref<16x32xf32, #tpu.memory_space<vmem>>, %arg6: memref<1x32xf32, #tpu.memory_space<vmem>>, %arg7: memref<1x32xf32, #tpu.memory_space<vmem>>, %arg8: memref<16x32xf32, #tpu.memory_space<vmem>>, %arg9: memref<16x32xf32, #tpu.memory_space<vmem>>) attributes {dimension_semantics = [#tpu.dimension_semantics<parallel>, #tpu.dimension_semantics<arbitrary>], iteration_bounds = array<i64: 1, 1>, scalar_prefetch = 0 : i64, scratch_operands = 1 : i64, tpu.core_type = #tpu.core_type<tc>, window_params = [{transform_indices = @transform_0, window_bounds = array<i64: 16, 32>}, {transform_indices = @transform_1, window_bounds = array<i64: 32, 32>}, {pipeline_mode = #tpu.pipeline_mode<synchronous>, transform_indices = @transform_2, window_bounds = array<i64: 1, 32>}, {transform_indices = @transform_3, window_bounds = array<i64: 16, 32>}, {pipeline_mode = #tpu.pipeline_mode<synchronous>, transform_indices = @transform_4, window_bounds = array<i64: 1, 32>}, {pipeline_mode = #tpu.pipeline_mode<synchronous>, transform_indices = @transform_5, window_bounds = array<i64: 1, 32>}, {transform_indices = @transform_6, window_bounds = array<i64: 16, 32>}]} {
    %c0_i32 = arith.constant 0 : i32
    %0 = arith.cmpi eq, %arg1, %c0_i32 : i32
    %1 = arith.extui %0 : i1 to i32
    %c0_i32_0 = arith.constant 0 : i32
    %2 = arith.cmpi ne, %1, %c0_i32_0 : i32
    scf.if %2 {
      %cst_10 = arith.constant 0.000000e+00 : f32
      %12 = vector.broadcast %cst_10 : f32 to vector<16x32xf32>
      %c0_11 = arith.constant 0 : index
      %c0_12 = arith.constant 0 : index
      %13 = vector.load %arg9[%c0_11, %c0_12] : memref<16x32xf32, #tpu.memory_space<vmem>>, vector<16x32xf32>
      tpu.vector_store %arg9[%c0_11, %c0_12], %12 {strides = array<i32>} : memref<16x32xf32, #tpu.memory_space<vmem>>, vector<16x32xf32>,
    } else {
    }
    %c0 = arith.constant 0 : index
    %c0_1 = arith.constant 0 : index
    %3 = vector.load %arg9[%c0, %c0_1] : memref<16x32xf32, #tpu.memory_space<vmem>>, vector<16x32xf32>
    %c0_2 = arith.constant 0 : index
    %c0_3 = arith.constant 0 : index
    %4 = vector.load %arg2[%c0_2, %c0_3] : memref<16x32xbf16, #tpu.memory_space<vmem>>, vector<16x32xbf16>
    %c0_4 = arith.constant 0 : index
    %c0_5 = arith.constant 0 : index
    %5 = vector.load %arg3[%c0_4, %c0_5] : memref<32x32xbf16, #tpu.memory_space<vmem>>, vector<32x32xbf16>
    %cst = arith.constant dense<0.000000e+00> : vector<16x32xf32>
    %6 = tpu.matmul %4, %5, %cst {dimension_numbers = #tpu.dot_dimension_numbers<[1], [0], [0], [1], [0, 0, 1, 1], [], []>} : vector<16x32xbf16>, vector<32x32xbf16>, vector<16x32xf32> -> vector<16x32xf32>
    %7 = arith.addf %3, %6 : vector<16x32xf32>
    %c0_6 = arith.constant 0 : index
    %c0_7 = arith.constant 0 : index
    %8 = vector.load %arg9[%c0_6, %c0_7] : memref<16x32xf32, #tpu.memory_space<vmem>>, vector<16x32xf32>
    tpu.vector_store %arg9[%c0_6, %c0_7], %7 {strides = array<i32>} : memref<16x32xf32, #tpu.memory_space<vmem>>, vector<16x32xf32>,
    %c0_i32_8 = arith.constant 0 : i32
    %9 = arith.cmpi eq, %arg1, %c0_i32_8 : i32
    %10 = arith.extui %9 : i1 to i32
    %c0_i32_9 = arith.constant 0 : i32
    %11 = arith.cmpi ne, %10, %c0_i32_9 : i32
    scf.if %11 {
      %c0_10 = arith.constant 0 : index
      %c0_11 = arith.constant 0 : index
      %12 = vector.load %arg9[%c0_10, %c0_11] : memref<16x32xf32, #tpu.memory_space<vmem>>, vector<16x32xf32>
      %c0_12 = arith.constant 0 : index
      %c0_13 = arith.constant 0 : index
      %13 = vector.load %arg4[%c0_12, %c0_13] : memref<1x32xf32, #tpu.memory_space<vmem>>, vector<1x32xf32>
      %14 = vector.broadcast %13 : vector<1x32xf32> to vector<16x32xf32>
      %15 = arith.addf %12, %14 : vector<16x32xf32>
      %c0_14 = arith.constant 0 : index
      %c0_15 = arith.constant 0 : index
      %16 = vector.load %arg5[%c0_14, %c0_15] : memref<16x32xf32, #tpu.memory_space<vmem>>, vector<16x32xf32>
      %17 = arith.addf %15, %16 : vector<16x32xf32>
      %cst_16 = arith.constant dense<0.000000e+00> : vector<16xf32>
      %18 = vector.multi_reduction <add>, %17, %cst_16 [1] : vector<16x32xf32> to vector<16xf32>
      %19 = vector.shape_cast %18 : vector<16xf32> to vector<16x1xf32>
      %cst_17 = arith.constant 3.200000e+01 : f32
      %20 = vector.broadcast %cst_17 : f32 to vector<16x1xf32>
      %21 = arith.divf %19, %20 : vector<16x1xf32>
      %22 = vector.broadcast %21 : vector<16x1xf32> to vector<16x32xf32>
      %23 = arith.subf %17, %22 : vector<16x32xf32>
      %24 = arith.mulf %23, %23 : vector<16x32xf32>
      %cst_18 = arith.constant dense<0.000000e+00> : vector<16xf32>
      %25 = vector.multi_reduction <add>, %24, %cst_18 [1] : vector<16x32xf32> to vector<16xf32>
      %26 = vector.shape_cast %25 : vector<16xf32> to vector<16x1xf32>
      %cst_19 = arith.constant 3.200000e+01 : f32
      %27 = vector.broadcast %cst_19 : f32 to vector<16x1xf32>
      %28 = arith.divf %26, %27 : vector<16x1xf32>
      %29 = vector.broadcast %21 : vector<16x1xf32> to vector<16x32xf32>
      %30 = arith.subf %17, %29 : vector<16x32xf32>
      %cst_20 = arith.constant 9.99999996E-13 : f32
      %31 = vector.broadcast %cst_20 : f32 to vector<16x1xf32>
      %32 = arith.addf %28, %31 : vector<16x1xf32>
      %33 = math.rsqrt %32 : vector<16x1xf32>
      %34 = vector.broadcast %33 : vector<16x1xf32> to vector<16x32xf32>
      %35 = arith.mulf %30, %34 : vector<16x32xf32>
      %c0_21 = arith.constant 0 : index
      %c0_22 = arith.constant 0 : index
      %36 = vector.load %arg6[%c0_21, %c0_22] : memref<1x32xf32, #tpu.memory_space<vmem>>, vector<1x32xf32>
      %37 = vector.broadcast %36 : vector<1x32xf32> to vector<16x32xf32>
      %38 = arith.mulf %35, %37 : vector<16x32xf32>
      %c0_23 = arith.constant 0 : index
      %c0_24 = arith.constant 0 : index
      %39 = vector.load %arg7[%c0_23, %c0_24] : memref<1x32xf32, #tpu.memory_space<vmem>>, vector<1x32xf32>
      %40 = vector.broadcast %39 : vector<1x32xf32> to vector<16x32xf32>
      %41 = arith.addf %38, %40 : vector<16x32xf32>
      %c0_25 = arith.constant 0 : index
      %c0_26 = arith.constant 0 : index
      %42 = vector.load %arg8[%c0_25, %c0_26] : memref<16x32xf32, #tpu.memory_space<vmem>>, vector<16x32xf32>
      tpu.vector_store %arg8[%c0_25, %c0_26], %41 {strides = array<i32>} : memref<16x32xf32, #tpu.memory_space<vmem>>, vector<16x32xf32>,
    } else {
    }
    return
  }
  func.func @transform_0(%arg0: i32, %arg1: i32) -> (i32, i32) {
    %c0_i32 = arith.constant 0 : i32
    return %arg0, %arg1 : i32, i32
  }
  func.func @transform_1(%arg0: i32, %arg1: i32) -> (i32, i32) {
    %c0_i32 = arith.constant 0 : i32
    %c0_i32_0 = arith.constant 0 : i32
    return %arg1, %c0_i32 : i32, i32
  }
  func.func @transform_2(%arg0: i32, %arg1: i32) -> (i32, i32) {
    %c0_i32 = arith.constant 0 : i32
    %c0_i32_0 = arith.constant 0 : i32
    %c0_i32_1 = arith.constant 0 : i32
    return %c0_i32, %c0_i32_0 : i32, i32
  }
  func.func @transform_3(%arg0: i32, %arg1: i32) -> (i32, i32) {
    %c0_i32 = arith.constant 0 : i32
    %c0_i32_0 = arith.constant 0 : i32
    return %arg0, %c0_i32 : i32, i32
  }
  func.func @transform_4(%arg0: i32, %arg1: i32) -> (i32, i32) {
    %c0_i32 = arith.constant 0 : i32
    %c0_i32_0 = arith.constant 0 : i32
    %c0_i32_1 = arith.constant 0 : i32
    return %c0_i32, %c0_i32_0 : i32, i32
  }
  func.func @transform_5(%arg0: i32, %arg1: i32) -> (i32, i32) {
    %c0_i32 = arith.constant 0 : i32
    %c0_i32_0 = arith.constant 0 : i32
    %c0_i32_1 = arith.constant 0 : i32
    return %c0_i32, %c0_i32_0 : i32, i32
  }
  func.func @transform_6(%arg0: i32, %arg1: i32) -> (i32, i32) {
    %c0_i32 = arith.constant 0 : i32
    %c0_i32_0 = arith.constant 0 : i32
    return %arg0, %c0_i32 : i32, i32
  }
}

module attributes {stable_mosaic.version = 11 : i64} {
  func.func @_matmul_kernel(%arg0: i32, %arg1: i32, %arg2: i32, %arg3: memref<16x32xf32, #tpu.memory_space<vmem>>, %arg4: memref<32x64xbf16, #tpu.memory_space<vmem>>, %arg5: memref<1x64xf32, #tpu.memory_space<vmem>>, %arg6: memref<16x64xbf16, #tpu.memory_space<vmem>>, %arg7: memref<16x64xf32, #tpu.memory_space<vmem>>) attributes {dimension_semantics = [#tpu.dimension_semantics<parallel>, #tpu.dimension_semantics<parallel>, #tpu.dimension_semantics<arbitrary>], iteration_bounds = array<i64: 1, 1, 1>, scalar_prefetch = 0 : i64, scratch_operands = 1 : i64, tpu.core_type = #tpu.core_type<tc>, window_params = [{transform_indices = @transform_0, window_bounds = array<i64: 16, 32>}, {transform_indices = @transform_1, window_bounds = array<i64: 32, 64>}, {transform_indices = @transform_2, window_bounds = array<i64: 1, 64>}, {transform_indices = @transform_3, window_bounds = array<i64: 16, 64>}]} {
    %c0_i32 = arith.constant 0 : i32
    %0 = arith.cmpi eq, %arg2, %c0_i32 : i32
    %1 = arith.extui %0 : i1 to i32
    %c0_i32_0 = arith.constant 0 : i32
    %2 = arith.cmpi ne, %1, %c0_i32_0 : i32
    scf.if %2 {
      %cst_10 = arith.constant 0.000000e+00 : f32
      %13 = vector.broadcast %cst_10 : f32 to vector<16x64xf32>
      %c0_11 = arith.constant 0 : index
      %c0_12 = arith.constant 0 : index
      %14 = vector.load %arg7[%c0_11, %c0_12] : memref<16x64xf32, #tpu.memory_space<vmem>>, vector<16x64xf32>
      tpu.vector_store %arg7[%c0_11, %c0_12], %13 {strides = array<i32>} : memref<16x64xf32, #tpu.memory_space<vmem>>, vector<16x64xf32>,
    } else {
    }
    %c0 = arith.constant 0 : index
    %c0_1 = arith.constant 0 : index
    %3 = vector.load %arg7[%c0, %c0_1] : memref<16x64xf32, #tpu.memory_space<vmem>>, vector<16x64xf32>
    %c0_2 = arith.constant 0 : index
    %c0_3 = arith.constant 0 : index
    %4 = vector.load %arg3[%c0_2, %c0_3] : memref<16x32xf32, #tpu.memory_space<vmem>>, vector<16x32xf32>
    %5 = arith.truncf %4 : vector<16x32xf32> to vector<16x32xbf16>
    %c0_4 = arith.constant 0 : index
    %c0_5 = arith.constant 0 : index
    %6 = vector.load %arg4[%c0_4, %c0_5] : memref<32x64xbf16, #tpu.memory_space<vmem>>, vector<32x64xbf16>
    %cst = arith.constant dense<0.000000e+00> : vector<16x64xf32>
    %7 = tpu.matmul %5, %6, %cst {dimension_numbers = #tpu.dot_dimension_numbers<[1], [0], [0], [1], [0, 0, 1, 1], [], []>} : vector<16x32xbf16>, vector<32x64xbf16>, vector<16x64xf32> -> vector<16x64xf32>
    %8 = arith.addf %3, %7 : vector<16x64xf32>
    %c0_6 = arith.constant 0 : index
    %c0_7 = arith.constant 0 : index
    %9 = vector.load %arg7[%c0_6, %c0_7] : memref<16x64xf32, #tpu.memory_space<vmem>>, vector<16x64xf32>
    tpu.vector_store %arg7[%c0_6, %c0_7], %8 {strides = array<i32>} : memref<16x64xf32, #tpu.memory_space<vmem>>, vector<16x64xf32>,
    %c0_i32_8 = arith.constant 0 : i32
    %10 = arith.cmpi eq, %arg2, %c0_i32_8 : i32
    %11 = arith.extui %10 : i1 to i32
    %c0_i32_9 = arith.constant 0 : i32
    %12 = arith.cmpi ne, %11, %c0_i32_9 : i32
    scf.if %12 {
      %c0_10 = arith.constant 0 : index
      %c0_11 = arith.constant 0 : index
      %13 = vector.load %arg7[%c0_10, %c0_11] : memref<16x64xf32, #tpu.memory_space<vmem>>, vector<16x64xf32>
      %c0_12 = arith.constant 0 : index
      %c0_13 = arith.constant 0 : index
      %14 = vector.load %arg5[%c0_12, %c0_13] : memref<1x64xf32, #tpu.memory_space<vmem>>, vector<1x64xf32>
      %15 = vector.broadcast %14 : vector<1x64xf32> to vector<16x64xf32>
      %16 = arith.addf %13, %15 : vector<16x64xf32>
      %17 = arith.mulf %16, %16 : vector<16x64xf32>
      %18 = arith.mulf %16, %17 : vector<16x64xf32>
      %cst_14 = arith.constant 4.471500e-02 : f32
      %19 = vector.broadcast %cst_14 : f32 to vector<16x64xf32>
      %20 = arith.mulf %19, %18 : vector<16x64xf32>
      %21 = arith.addf %16, %20 : vector<16x64xf32>
      %cst_15 = arith.constant 0.797884583 : f32
      %22 = vector.broadcast %cst_15 : f32 to vector<16x64xf32>
      %23 = arith.mulf %22, %21 : vector<16x64xf32>
      %24 = math.tanh %23 : vector<16x64xf32>
      %cst_16 = arith.constant 1.000000e+00 : f32
      %25 = vector.broadcast %cst_16 : f32 to vector<16x64xf32>
      %26 = arith.addf %25, %24 : vector<16x64xf32>
      %cst_17 = arith.constant 5.000000e-01 : f32
      %27 = vector.broadcast %cst_17 : f32 to vector<16x64xf32>
      %28 = arith.mulf %27, %26 : vector<16x64xf32>
      %29 = arith.mulf %16, %28 : vector<16x64xf32>
      %30 = arith.truncf %29 : vector<16x64xf32> to vector<16x64xbf16>
      %c0_18 = arith.constant 0 : index
      %c0_19 = arith.constant 0 : index
      %31 = vector.load %arg6[%c0_18, %c0_19] : memref<16x64xbf16, #tpu.memory_space<vmem>>, vector<16x64xbf16>
      tpu.vector_store %arg6[%c0_18, %c0_19], %30 {strides = array<i32>} : memref<16x64xbf16, #tpu.memory_space<vmem>>, vector<16x64xbf16>,
    } else {
    }
    return
  }
  func.func @transform_0(%arg0: i32, %arg1: i32, %arg2: i32) -> (i32, i32) {
    %c0_i32 = arith.constant 0 : i32
    return %arg0, %arg2 : i32, i32
  }
  func.func @transform_1(%arg0: i32, %arg1: i32, %arg2: i32) -> (i32, i32) {
    %c0_i32 = arith.constant 0 : i32
    return %arg2, %arg1 : i32, i32
  }
  func.func @transform_2(%arg0: i32, %arg1: i32, %arg2: i32) -> (i32, i32) {
    %c0_i32 = arith.constant 0 : i32
    %c0_i32_0 = arith.constant 0 : i32
    return %c0_i32, %arg1 : i32, i32
  }
  func.func @transform_3(%arg0: i32, %arg1: i32, %arg2: i32) -> (i32, i32) {
    %c0_i32 = arith.constant 0 : i32
    return %arg0, %arg1 : i32, i32
  }
}

module attributes {stable_mosaic.version = 11 : i64} {
  func.func @_regression_head_kernel(%arg0: i32, %arg1: memref<2x32xf32, #tpu.memory_space<vmem>>, %arg2: memref<32x256xbf16, #tpu.memory_space<vmem>>, %arg3: memref<1x256xf32, #tpu.memory_space<vmem>>, %arg4: memref<256x128xbf16, #tpu.memory_space<vmem>>, %arg5: memref<1x128xf32, #tpu.memory_space<vmem>>, %arg6: memref<2x128xf32, #tpu.memory_space<vmem>>) attributes {dimension_semantics = [#tpu.dimension_semantics<parallel>], iteration_bounds = array<i64: 1>, scalar_prefetch = 0 : i64, scratch_operands = 0 : i64, tpu.core_type = #tpu.core_type<tc>, window_params = [{transform_indices = @transform_0, window_bounds = array<i64: 2, 32>}, {pipeline_mode = #tpu.pipeline_mode<synchronous>, transform_indices = @transform_1, window_bounds = array<i64: 32, 256>}, {pipeline_mode = #tpu.pipeline_mode<synchronous>, transform_indices = @transform_2, window_bounds = array<i64: 1, 256>}, {pipeline_mode = #tpu.pipeline_mode<synchronous>, transform_indices = @transform_3, window_bounds = array<i64: 256, 128>}, {pipeline_mode = #tpu.pipeline_mode<synchronous>, transform_indices = @transform_4, window_bounds = array<i64: 1, 128>}, {transform_indices = @transform_5, window_bounds = array<i64: 2, 128>}]} {
    %c0 = arith.constant 0 : index
    %c0_0 = arith.constant 0 : index
    %0 = vector.load %arg1[%c0, %c0_0] : memref<2x32xf32, #tpu.memory_space<vmem>>, vector<2x32xf32>
    %1 = arith.truncf %0 : vector<2x32xf32> to vector<2x32xbf16>
    %c0_1 = arith.constant 0 : index
    %c0_2 = arith.constant 0 : index
    %2 = vector.load %arg2[%c0_1, %c0_2] : memref<32x256xbf16, #tpu.memory_space<vmem>>, vector<32x256xbf16>
    %cst = arith.constant dense<0.000000e+00> : vector<2x256xf32>
    %3 = tpu.matmul %1, %2, %cst {dimension_numbers = #tpu.dot_dimension_numbers<[1], [0], [0], [1], [0, 0, 1, 1], [], []>} : vector<2x32xbf16>, vector<32x256xbf16>, vector<2x256xf32> -> vector<2x256xf32>
    %c0_3 = arith.constant 0 : index
    %c0_4 = arith.constant 0 : index
    %4 = vector.load %arg3[%c0_3, %c0_4] : memref<1x256xf32, #tpu.memory_space<vmem>>, vector<1x256xf32>
    %5 = vector.broadcast %4 : vector<1x256xf32> to vector<2x256xf32>
    %6 = arith.addf %3, %5 : vector<2x256xf32>
    %cst_5 = arith.constant 0.000000e+00 : f32
    %7 = vector.broadcast %cst_5 : f32 to vector<2x256xf32>
    %8 = arith.maximumf %6, %7 : vector<2x256xf32>
    %9 = arith.truncf %8 : vector<2x256xf32> to vector<2x256xbf16>
    %c0_6 = arith.constant 0 : index
    %c0_7 = arith.constant 0 : index
    %10 = vector.load %arg4[%c0_6, %c0_7] : memref<256x128xbf16, #tpu.memory_space<vmem>>, vector<256x128xbf16>
    %cst_8 = arith.constant dense<0.000000e+00> : vector<2x128xf32>
    %11 = tpu.matmul %9, %10, %cst_8 {dimension_numbers = #tpu.dot_dimension_numbers<[1], [0], [0], [1], [0, 0, 1, 1], [], []>} : vector<2x256xbf16>, vector<256x128xbf16>, vector<2x128xf32> -> vector<2x128xf32>
    %c0_9 = arith.constant 0 : index
    %c0_10 = arith.constant 0 : index
    %12 = vector.load %arg5[%c0_9, %c0_10] : memref<1x128xf32, #tpu.memory_space<vmem>>, vector<1x128xf32>
    %13 = vector.broadcast %12 : vector<1x128xf32> to vector<2x128xf32>
    %14 = arith.addf %11, %13 : vector<2x128xf32>
    %c0_11 = arith.constant 0 : index
    %c0_12 = arith.constant 0 : index
    %15 = vector.load %arg6[%c0_11, %c0_12] : memref<2x128xf32, #tpu.memory_space<vmem>>, vector<2x128xf32>
    tpu.vector_store %arg6[%c0_11, %c0_12], %14 {strides = array<i32>} : memref<2x128xf32, #tpu.memory_space<vmem>>, vector<2x128xf32>,
    return
  }
  func.func @transform_0(%arg0: i32) -> (i32, i32) {
    %c0_i32 = arith.constant 0 : i32
    %c0_i32_0 = arith.constant 0 : i32
    return %arg0, %c0_i32 : i32, i32
  }
  func.func @transform_1(%arg0: i32) -> (i32, i32) {
    %c0_i32 = arith.constant 0 : i32
    %c0_i32_0 = arith.constant 0 : i32
    %c0_i32_1 = arith.constant 0 : i32
    return %c0_i32, %c0_i32_0 : i32, i32
  }
  func.func @transform_2(%arg0: i32) -> (i32, i32) {
    %c0_i32 = arith.constant 0 : i32
    %c0_i32_0 = arith.constant 0 : i32
    %c0_i32_1 = arith.constant 0 : i32
    return %c0_i32, %c0_i32_0 : i32, i32
  }
  func.func @transform_3(%arg0: i32) -> (i32, i32) {
    %c0_i32 = arith.constant 0 : i32
    %c0_i32_0 = arith.constant 0 : i32
    %c0_i32_1 = arith.constant 0 : i32
    return %c0_i32, %c0_i32_0 : i32, i32
  }
  func.func @transform_4(%arg0: i32) -> (i32, i32) {
    %c0_i32 = arith.constant 0 : i32
    %c0_i32_0 = arith.constant 0 : i32
    %c0_i32_1 = arith.constant 0 : i32
    return %c0_i32, %c0_i32_0 : i32, i32
  }
  func.func @transform_5(%arg0: i32) -> (i32, i32) {
    %c0_i32 = arith.constant 0 : i32
    %c0_i32_0 = arith.constant 0 : i32
    return %arg0, %c0_i32 : i32, i32
  }
}

module attributes {stable_mosaic.version = 11 : i64} {
  func.func @_matmul_add_ln_kernel(%arg0: i32, %arg1: i32, %arg2: memref<16x64xbf16, #tpu.memory_space<vmem>>, %arg3: memref<64x32xbf16, #tpu.memory_space<vmem>>, %arg4: memref<1x32xf32, #tpu.memory_space<vmem>>, %arg5: memref<16x32xf32, #tpu.memory_space<vmem>>, %arg6: memref<1x32xf32, #tpu.memory_space<vmem>>, %arg7: memref<1x32xf32, #tpu.memory_space<vmem>>, %arg8: memref<16x32xf32, #tpu.memory_space<vmem>>, %arg9: memref<16x32xf32, #tpu.memory_space<vmem>>) attributes {dimension_semantics = [#tpu.dimension_semantics<parallel>, #tpu.dimension_semantics<arbitrary>], iteration_bounds = array<i64: 1, 1>, scalar_prefetch = 0 : i64, scratch_operands = 1 : i64, tpu.core_type = #tpu.core_type<tc>, window_params = [{transform_indices = @transform_0, window_bounds = array<i64: 16, 64>}, {transform_indices = @transform_1, window_bounds = array<i64: 64, 32>}, {pipeline_mode = #tpu.pipeline_mode<synchronous>, transform_indices = @transform_2, window_bounds = array<i64: 1, 32>}, {transform_indices = @transform_3, window_bounds = array<i64: 16, 32>}, {pipeline_mode = #tpu.pipeline_mode<synchronous>, transform_indices = @transform_4, window_bounds = array<i64: 1, 32>}, {pipeline_mode = #tpu.pipeline_mode<synchronous>, transform_indices = @transform_5, window_bounds = array<i64: 1, 32>}, {transform_indices = @transform_6, window_bounds = array<i64: 16, 32>}]} {
    %c0_i32 = arith.constant 0 : i32
    %0 = arith.cmpi eq, %arg1, %c0_i32 : i32
    %1 = arith.extui %0 : i1 to i32
    %c0_i32_0 = arith.constant 0 : i32
    %2 = arith.cmpi ne, %1, %c0_i32_0 : i32
    scf.if %2 {
      %cst_10 = arith.constant 0.000000e+00 : f32
      %12 = vector.broadcast %cst_10 : f32 to vector<16x32xf32>
      %c0_11 = arith.constant 0 : index
      %c0_12 = arith.constant 0 : index
      %13 = vector.load %arg9[%c0_11, %c0_12] : memref<16x32xf32, #tpu.memory_space<vmem>>, vector<16x32xf32>
      tpu.vector_store %arg9[%c0_11, %c0_12], %12 {strides = array<i32>} : memref<16x32xf32, #tpu.memory_space<vmem>>, vector<16x32xf32>,
    } else {
    }
    %c0 = arith.constant 0 : index
    %c0_1 = arith.constant 0 : index
    %3 = vector.load %arg9[%c0, %c0_1] : memref<16x32xf32, #tpu.memory_space<vmem>>, vector<16x32xf32>
    %c0_2 = arith.constant 0 : index
    %c0_3 = arith.constant 0 : index
    %4 = vector.load %arg2[%c0_2, %c0_3] : memref<16x64xbf16, #tpu.memory_space<vmem>>, vector<16x64xbf16>
    %c0_4 = arith.constant 0 : index
    %c0_5 = arith.constant 0 : index
    %5 = vector.load %arg3[%c0_4, %c0_5] : memref<64x32xbf16, #tpu.memory_space<vmem>>, vector<64x32xbf16>
    %cst = arith.constant dense<0.000000e+00> : vector<16x32xf32>
    %6 = tpu.matmul %4, %5, %cst {dimension_numbers = #tpu.dot_dimension_numbers<[1], [0], [0], [1], [0, 0, 1, 1], [], []>} : vector<16x64xbf16>, vector<64x32xbf16>, vector<16x32xf32> -> vector<16x32xf32>
    %7 = arith.addf %3, %6 : vector<16x32xf32>
    %c0_6 = arith.constant 0 : index
    %c0_7 = arith.constant 0 : index
    %8 = vector.load %arg9[%c0_6, %c0_7] : memref<16x32xf32, #tpu.memory_space<vmem>>, vector<16x32xf32>
    tpu.vector_store %arg9[%c0_6, %c0_7], %7 {strides = array<i32>} : memref<16x32xf32, #tpu.memory_space<vmem>>, vector<16x32xf32>,
    %c0_i32_8 = arith.constant 0 : i32
    %9 = arith.cmpi eq, %arg1, %c0_i32_8 : i32
    %10 = arith.extui %9 : i1 to i32
    %c0_i32_9 = arith.constant 0 : i32
    %11 = arith.cmpi ne, %10, %c0_i32_9 : i32
    scf.if %11 {
      %c0_10 = arith.constant 0 : index
      %c0_11 = arith.constant 0 : index
      %12 = vector.load %arg9[%c0_10, %c0_11] : memref<16x32xf32, #tpu.memory_space<vmem>>, vector<16x32xf32>
      %c0_12 = arith.constant 0 : index
      %c0_13 = arith.constant 0 : index
      %13 = vector.load %arg4[%c0_12, %c0_13] : memref<1x32xf32, #tpu.memory_space<vmem>>, vector<1x32xf32>
      %14 = vector.broadcast %13 : vector<1x32xf32> to vector<16x32xf32>
      %15 = arith.addf %12, %14 : vector<16x32xf32>
      %c0_14 = arith.constant 0 : index
      %c0_15 = arith.constant 0 : index
      %16 = vector.load %arg5[%c0_14, %c0_15] : memref<16x32xf32, #tpu.memory_space<vmem>>, vector<16x32xf32>
      %17 = arith.addf %15, %16 : vector<16x32xf32>
      %cst_16 = arith.constant dense<0.000000e+00> : vector<16xf32>
      %18 = vector.multi_reduction <add>, %17, %cst_16 [1] : vector<16x32xf32> to vector<16xf32>
      %19 = vector.shape_cast %18 : vector<16xf32> to vector<16x1xf32>
      %cst_17 = arith.constant 3.200000e+01 : f32
      %20 = vector.broadcast %cst_17 : f32 to vector<16x1xf32>
      %21 = arith.divf %19, %20 : vector<16x1xf32>
      %22 = vector.broadcast %21 : vector<16x1xf32> to vector<16x32xf32>
      %23 = arith.subf %17, %22 : vector<16x32xf32>
      %24 = arith.mulf %23, %23 : vector<16x32xf32>
      %cst_18 = arith.constant dense<0.000000e+00> : vector<16xf32>
      %25 = vector.multi_reduction <add>, %24, %cst_18 [1] : vector<16x32xf32> to vector<16xf32>
      %26 = vector.shape_cast %25 : vector<16xf32> to vector<16x1xf32>
      %cst_19 = arith.constant 3.200000e+01 : f32
      %27 = vector.broadcast %cst_19 : f32 to vector<16x1xf32>
      %28 = arith.divf %26, %27 : vector<16x1xf32>
      %29 = vector.broadcast %21 : vector<16x1xf32> to vector<16x32xf32>
      %30 = arith.subf %17, %29 : vector<16x32xf32>
      %cst_20 = arith.constant 9.99999996E-13 : f32
      %31 = vector.broadcast %cst_20 : f32 to vector<16x1xf32>
      %32 = arith.addf %28, %31 : vector<16x1xf32>
      %33 = math.rsqrt %32 : vector<16x1xf32>
      %34 = vector.broadcast %33 : vector<16x1xf32> to vector<16x32xf32>
      %35 = arith.mulf %30, %34 : vector<16x32xf32>
      %c0_21 = arith.constant 0 : index
      %c0_22 = arith.constant 0 : index
      %36 = vector.load %arg6[%c0_21, %c0_22] : memref<1x32xf32, #tpu.memory_space<vmem>>, vector<1x32xf32>
      %37 = vector.broadcast %36 : vector<1x32xf32> to vector<16x32xf32>
      %38 = arith.mulf %35, %37 : vector<16x32xf32>
      %c0_23 = arith.constant 0 : index
      %c0_24 = arith.constant 0 : index
      %39 = vector.load %arg7[%c0_23, %c0_24] : memref<1x32xf32, #tpu.memory_space<vmem>>, vector<1x32xf32>
      %40 = vector.broadcast %39 : vector<1x32xf32> to vector<16x32xf32>
      %41 = arith.addf %38, %40 : vector<16x32xf32>
      %c0_25 = arith.constant 0 : index
      %c0_26 = arith.constant 0 : index
      %42 = vector.load %arg8[%c0_25, %c0_26] : memref<16x32xf32, #tpu.memory_space<vmem>>, vector<16x32xf32>
      tpu.vector_store %arg8[%c0_25, %c0_26], %41 {strides = array<i32>} : memref<16x32xf32, #tpu.memory_space<vmem>>, vector<16x32xf32>,
    } else {
    }
    return
  }
  func.func @transform_0(%arg0: i32, %arg1: i32) -> (i32, i32) {
    %c0_i32 = arith.constant 0 : i32
    return %arg0, %arg1 : i32, i32
  }
  func.func @transform_1(%arg0: i32, %arg1: i32) -> (i32, i32) {
    %c0_i32 = arith.constant 0 : i32
    %c0_i32_0 = arith.constant 0 : i32
    return %arg1, %c0_i32 : i32, i32
  }
  func.func @transform_2(%arg0: i32, %arg1: i32) -> (i32, i32) {
    %c0_i32 = arith.constant 0 : i32
    %c0_i32_0 = arith.constant 0 : i32
    %c0_i32_1 = arith.constant 0 : i32
    return %c0_i32, %c0_i32_0 : i32, i32
  }
  func.func @transform_3(%arg0: i32, %arg1: i32) -> (i32, i32) {
    %c0_i32 = arith.constant 0 : i32
    %c0_i32_0 = arith.constant 0 : i32
    return %arg0, %c0_i32 : i32, i32
  }
  func.func @transform_4(%arg0: i32, %arg1: i32) -> (i32, i32) {
    %c0_i32 = arith.constant 0 : i32
    %c0_i32_0 = arith.constant 0 : i32
    %c0_i32_1 = arith.constant 0 : i32
    return %c0_i32, %c0_i32_0 : i32, i32
  }
  func.func @transform_5(%arg0: i32, %arg1: i32) -> (i32, i32) {
    %c0_i32 = arith.constant 0 : i32
    %c0_i32_0 = arith.constant 0 : i32
    %c0_i32_1 = arith.constant 0 : i32
    return %c0_i32, %c0_i32_0 : i32, i32
  }
  func.func @transform_6(%arg0: i32, %arg1: i32) -> (i32, i32) {
    %c0_i32 = arith.constant 0 : i32
    %c0_i32_0 = arith.constant 0 : i32
    return %arg0, %c0_i32 : i32, i32
  }
}

</mosaic_0001>

<bundles_post_ra>
// kernel: mlm_with_regression_head.8
= control target key start
LH: loop header
LB: loop body
LE: loop exit
PB: predicated region body
PF: predicated region fallthrough
CT: control target
= control target key end

     0   :  { %vm19_vm0 = vcmask 785408   ;;  %v99_v1 = vmov 0.0   ;;  %vm43_vm1 = vcmask 261120   ;;  %vm79_vm2 = vcmask 781312   ;;  %s145_s1 = inlined_call_operand.vmem [shape: bf16[32,96], index: 1, kind: input, shape index: {}]   ;;  %s146_s0 = inlined_call_operand.vmem [shape: f32[16,32], index: 0, kind: input, shape index: {}]   ;;  %s147_s2 = inlined_call_operand.vmem [shape: f32[1,96], index: 2, kind: input, shape index: {}]   ;;  %s148_s3 = inlined_call_operand.vmem [shape: bf16[16,96], index: 3, kind: output, shape index: {}]  }
   0x1   :  { %v96_v0 = vld [vmem:[%s145_s1 + $0x8] sm:$0xff]  ;;  %20 = vst.msk [vmem:[#allocation2] sm:$0xff] %vm19_vm0, %v99_v1  ;;  %v95_v2 = vld [vmem:[%s145_s1] sm:$0xff] }
   0x2   :  { %21 = vst.msk [vmem:[#allocation2 + $0x8] sm:$0xff] %vm19_vm0, %v99_v1  ;;  %53 = vmatpush.bf16.msra.mxu0 %v96_v0  ;;  %v24_v3 = vld [vmem:[%s146_s0] sm:$0xff]  ;;  %v25_v4 = vld [vmem:[%s146_s0 + $0x8] sm:$0xff] }
   0x3   :  { %v26_v5 = vpack.c.bf16 %v25_v4, %v24_v3  ;;  %v98_v10 = vld [vmem:[%s147_s2] ss:$0 sm:$0xff] }
   0x6   :  { %54 = vmatpush.bf16.msra.mxu0 %v95_v2 }
   0x8   :  { %v22_v6 = vld [vmem:[#allocation2] sm:$0xff] }
   0x9   :  { %94 = vmatmul.msk.bf16.vlgmr.msra.gmra.mxu0 %vm43_vm1, %v26_v5  ;;  %v23_v9 = vld [vmem:[#allocation2 + $0x8] sm:$0xff] }
  0x86   :  { %v56_v7 = vpop.f32.mrf.mxu0 }
  0x87   :  { %v61_v8 = vadd.f32 %v56_v7, %v22_v6 }
  0x89   :  { %64 = vst.msk [vmem:[#allocation2] sm:$0xff] %vm19_vm0, %v61_v8 }
  0x8e   :  { %v58_v11 = vpop.f32.mrf.mxu0 }
  0x8f   :  { %v62_v12 = vadd.f32 %v58_v11, %v23_v9 }
  0x90   :  { %v69_v13 = vld [vmem:[#allocation2] sm:$0xff] }
  0x91   :  { %v75_v14 = vadd.f32 %v98_v10, %v69_v13  ;;  %65 = vst.msk [vmem:[#allocation2 + $0x8] sm:$0xff] %vm19_vm0, %v62_v12 }
  0x93   :  { %v77_v15 = vpack.c.bf16 %v75_v14, %v75_v14 }
  0x95   :  { %80 = vst.msk [vmem:[%s148_s3] sm:$0xf] %vm79_vm2, %v77_v15 }
  0x98   :  { %v70_v16 = vld [vmem:[#allocation2 + $0x8] sm:$0xff] }
  0x99   :  { %v76_v17 = vadd.f32 %v98_v10, %v70_v16 }
  0x9b   :  { %v78_v18 = vpack.c.bf16 %v76_v17, %v76_v17 }
  0x9d   :  { %81 = vst.msk [vmem:[%s148_s3 + $0x4] sm:$0xf] %vm79_vm2, %v78_v18 }

// kernel: mlm_with_regression_head.7
= control target key start
LH: loop header
LB: loop body
LE: loop exit
PB: predicated region body
PF: predicated region fallthrough
CT: control target
= control target key end

     0   :  { %vm16_vm0 = vcmask 261120   ;;  %v95_v4 = vmov 32.0   ;;  %s140_s0 = inlined_call_operand.vmem [shape: f32[16,32], index: 0, kind: input, shape index: {}]   ;;  %s141_s1 = inlined_call_operand.vmem [shape: f32[1,32], index: 1, kind: input, shape index: {}]   ;;  %s142_s2 = inlined_call_operand.vmem [shape: f32[1,32], index: 2, kind: input, shape index: {}]   ;;  %s143_s3 = inlined_call_operand.vmem [shape: f32[16,32], index: 3, kind: output, shape index: {}]  }
   0x1   :  { %v14_v0 = vld [vmem:[%s140_s0] sm:$0xff]  ;;  %v15_v2 = vld [vmem:[%s140_s0 + $0x8] sm:$0xff]  ;;  %89 = vrcp.f32 %v95_v4 }
   0x2   :  { %v17_v1 = vsel %vm16_vm0, %v14_v0, 0.0  ;;  %v20_v3 = vsel %vm16_vm0, %v15_v2, 0.0  ;;  %v87_v35 = vld [vmem:[%s141_s1] ss:$0 sm:$0xff] }
   0x3   :  { %18 = vadd.xlane.f32.xlu0 %v17_v1  ;;  %v88_v38 = vld [vmem:[%s142_s2] ss:$0 sm:$0xff] }
   0x7   :  { %v90_v5 = vpop.eup %89 }
   0x8   :  { %v24_v6 = vmul.f32 32.0, %v90_v5  ;;  %vm28_vm1 = vweird.f32 %v90_v5 }
   0xa   :  { %v25_v7 = vsub.f32 1.0, %v24_v6 }
   0xb   :  { %21 = vadd.xlane.f32.xlu0 %v20_v3 }
   0xc   :  { %v26_v8 = vmul.f32 %v90_v5, %v25_v7 }
   0xe   :  { %v27_v9 = vadd.f32 %v90_v5, %v26_v8 }
  0x10   :  { %v29_v10 = vsel %vm28_vm1, %v90_v5, %v27_v9 }
  0x76   :  { %v19_v11 = vpop.xlane.xlu0 %18 }
  0x77   :  { %v30_v12 = vmul.f32 %v29_v10, %v19_v11 }
  0x79   :  { %v32_v13 = vsub.f32 %v14_v0, %v30_v12 }
  0x7b   :  { %v34_v14 = vmul.f32 %v32_v13, %v32_v13 }
  0x7d   :  { %v36_v15 = vsel %vm16_vm0, %v34_v14, 0.0 }
  0x7e   :  { %37 = vadd.xlane.f32.xlu1 %v36_v15  ;;  %v22_v16 = vpop.xlane.xlu0 %21 }
  0x7f   :  { %v31_v17 = vmul.f32 %v29_v10, %v22_v16 }
  0x81   :  { %v33_v18 = vsub.f32 %v15_v2, %v31_v17 }
  0x83   :  { %v35_v19 = vmul.f32 %v33_v18, %v33_v18 }
  0x85   :  { %v39_v20 = vsel %vm16_vm0, %v35_v19, 0.0 }
  0x86   :  { %40 = vadd.xlane.f32.xlu1 %v39_v20 }
  0xf1   :  { %v38_v21 = vpop.xlane.xlu1 %37 }
  0xf2   :  { %v42_v22 = vmul.f32 %v38_v21, %v29_v10 }
  0xf4   :  { %v44_v23 = vadd.f32 1e-12, %v42_v22 }
  0xf6   :  { %91 = vrsqrt.f32 %v44_v23  ;;  %vm52_vm3 = vweird.f32 %v44_v23 }
  0xf9   :  { %v41_v24 = vpop.xlane.xlu1 %40 }
  0xfa   :  { %v43_v25 = vmul.f32 %v41_v24, %v29_v10 }
  0xfc   :  { %v92_v26 = vpop.eup %91  ;;  %v45_v27 = vadd.f32 1e-12, %v43_v25 }
  0xfd   :  { %v47_v28 = vmul.f32 %v92_v26, %v44_v23  ;;  %vm53_vm2 = vweird.f32 %v92_v26 }
  0xfe   :  { %93 = vrsqrt.f32 %v45_v27  ;;  %vm54_vm4 = vmor %vm52_vm3, %vm53_vm2  ;;  %vm62_vm6 = vweird.f32 %v45_v27 }
  0xff   :  { %v48_v29 = vmul.f32 %v92_v26, %v47_v28 }
 0x101   :  { %v49_v30 = vmul.f32 0.5, %v48_v29 }
 0x103   :  { %v50_v31 = vsub.f32 1.5, %v49_v30 }
 0x104   :  { %v94_v32 = vpop.eup %93 }
 0x105   :  { %v51_v33 = vmul.f32 %v92_v26, %v50_v31  ;;  %v57_v34 = vmul.f32 %v94_v32, %v45_v27  ;;  %vm63_vm5 = vweird.f32 %v94_v32 }
 0x106   :  { %vm64_vm7 = vmor %vm62_vm6, %vm63_vm5 }
 0x107   :  { %v55_v36 = vsel %vm54_vm4, %v92_v26, %v51_v33  ;;  %v58_v37 = vmul.f32 %v94_v32, %v57_v34 }
 0x108   :  { %v66_v39 = vmul.f32 %v55_v36, %v32_v13 }
 0x109   :  { %v59_v40 = vmul.f32 0.5, %v58_v37 }
 0x10a   :  { %v72_v41 = vmul.f32 %v87_v35, %v66_v39 }
 0x10b   :  { %v60_v42 = vsub.f32 1.5, %v59_v40 }
 0x10c   :  { %v78_v43 = vadd.f32 %v88_v38, %v72_v41 }
 0x10d   :  { %v61_v44 = vmul.f32 %v94_v32, %v60_v42 }
 0x10e   :  { %80 = vst.msk [vmem:[%s143_s3] sm:$0xff] %vm16_vm0, %v78_v43 }
 0x10f   :  { %v65_v45 = vsel %vm64_vm7, %v94_v32, %v61_v44 }
 0x110   :  { %v67_v46 = vmul.f32 %v65_v45, %v33_v18 }
 0x112   :  { %v73_v47 = vmul.f32 %v87_v35, %v67_v46 }
 0x114   :  { %v79_v48 = vadd.f32 %v88_v38, %v73_v47 }
 0x116   :  { %81 = vst.msk [vmem:[%s143_s3 + $0x8] sm:$0xff] %vm16_vm0, %v79_v48 }

// kernel: mlm_with_regression_head.9
= control target key start
LH: loop header
LB: loop body
LE: loop exit
PB: predicated region body
PF: predicated region fallthrough
CT: control target
= control target key end

     0   :  { %s775_s15 = smov 0   ;;  %s777_s16 = smov 0   ;;  %s852_s0 = inlined_call_operand.vmem [shape: f32[2,1,8], index: 0, kind: input, shape index: {}]   ;;  %s853_s1 = inlined_call_operand.vmem [shape: bf16[2,4,8,8], index: 1, kind: input, shape index: {}]   ;;  %s854_s2 = inlined_call_operand.vmem [shape: bf16[2,4,8,8], index: 2, kind: input, shape index: {}]   ;;  %s855_s3 = inlined_call_operand.vmem [shape: bf16[2,4,8,8], index: 3, kind: input, shape index: {}]   ;;  %s856_s4 = inlined_call_operand.vmem [shape: bf16[2,4,8,8], index: 4, kind: output, shape index: {}]  }
   0x1   :  { %s779_s17 = smov 0   ;;  %s781_s18 = smov 0  }
   0x2   :  { %s783_s19 = smov 0  }
   0x3 LB: > { %s36_s20 = sadd.s32 1, %s737_s17  ;;  %s40_s21 = sadd.s32 1, %s741_s18  ;;  %s745_s19 = sphi %s783_s19, %s14_s19   ;;  %s741_s18 = sphi %s781_s18, %s860_s18   ;;  %s737_s17 = sphi %s779_s17, %s859_s17   ;;  %s733_s16 = sphi %s777_s16, %s858_s16   ;;  %s729_s15 = sphi %s775_s15, %s857_s15  }
   0x4   : > { %p38_p0 = scmp.ge.s32.totalorder %s36_s20, 4  ;;  %p641_p1 = scmp.ge.s32.totalorder %s745_s19, 1 }
   0x5   : > { %p255_p2 = scmp.lt.s32.totalorder %s745_s19, 9 }
   0x6   : > { %s862_s20 = smov (%p38_p0, %s36_s20), 0  ;;  %s864_s21 = smov (!%p38_p0, %s40_s21), %s741_s18 }
   0x7   : > { %p256_p3 = pnand %p641_p1, %p255_p2  ;;  %p42_p4 = scmp.ge.s32.totalorder %s864_s21, 2 }
   0x8   : > { %p321_p5 = scmp.lt.s32.totalorder (!%p256_p3), %s733_s16, 1  ;;  %p329_p6 = scmp.lt.s32.totalorder (!%p256_p3), %s729_s15, 3 }
   0x9   : > { %s866_s21 = smov (%p42_p4, %s864_s21), 0  ;;  %259 = sbr.rel (%p256_p3) target bundleno = 631 (0x277), region = 36 }
   0xe   : > { %s868_s16 = smov (!%p321_p5, %s733_s16), 1  ;;  %s870_s15 = smov (!%p329_p6, %s729_s15), 3  ;;  %vm379_vm0 = vcmask 64512   ;;  %vm376_vm1 = vcmask 7168   ;;  %v747_v3 = vmov -1e+30  }
   0xf   : > { %s642_s22 = sshll.u32 %s868_s16, 2  ;;  %s326_s25 = scalar_lea.vmem %s852_s0, %s868_s16  ;;  %377 = vst.msk [vmem:[#allocation2] sm:$0xff] %vm376_vm1, %v747_v3  ;;  %v748_v9 = vmov 0   ;;  %v749_v10 = vmov 0.0   ;;  %vm443_vm2 = vcmask 1043456   ;;  %vm476_vm3 = vcmask 60416  }
  0x10   : > { %s335_s26 = sadd.s32 %s642_s22, %s870_s15  ;;  %v700_v4 = vld [vmem:[%s326_s25] ss:$0 sm:$0xff]  ;;  %697 = vset.pattern.permute.xlu0 %v748_v9  ;;  %698 = vset.pattern.permute.xlu1 %v748_v9  ;;  %378 = vst.msk [vmem:[#allocation3] sm:$0xff] %vm376_vm1, %v749_v10 }
  0x11   : > { %s808_s27 = sshll.u32 %s335_s26, 2  ;;  %699 = vset.pattern.permute.xlu2 %v748_v9  ;;  %380 = vst.msk [vmem:[#allocation4] sm:$0xff] %vm379_vm0, %v749_v10 }
  0x12   : > { %s348_s30 = scalar_lea.vmem %s854_s2, %s808_s27  ;;  %s337_s7 = scalar_lea.vmem %s853_s1, %s808_s27 }
  0x13   : > { %v382_v0 = vld [vmem:[%s348_s30] sm:$0xf]  ;;  %s359_s10 = scalar_lea.vmem %s855_s3, %s808_s27  ;;  %s370_s13 = scalar_lea.vmem %s856_s4, %s808_s27 }
  0x14   : > { %v392_v1 = vsel %vm379_vm0, %v382_v0, 0  ;;  %v381_v2 = vld [vmem:[%s337_s7] sm:$0xf] }
  0x15   : > { %401 = vmatpush.bf16.xpose.msra.mxu0 %v392_v1  ;;  %v439_v15 = vld [vmem:[%s359_s10] sm:$0xf] }
  0x16   : > { %v407_v11 = vld [vmem:[#allocation2] sm:$0xff]  ;;  %v445_v16 = vsel %vm443_vm2, %v439_v15, 0 }
  0x17   : > { %454 = vmatpush.bf16.msra.mxu1 %v445_v16  ;;  %v423_v25 = vld [vmem:[#allocation3] sm:$0xff] }
  0x18   : > { %v431_v33 = vld [vmem:[#allocation4] sm:$0xff] }
  0x1c   : > { %650 = vmatmul.msk.bf16.vlgmr.msra.gmra.mxu0 %vm379_vm0, %v381_v2 }
  0x99   : > { %v403_v5 = vpop.f32.mrf.mxu0 }
  0x9a   : > { %v404_v6 = vadd.f32 %v700_v4, %v403_v5 }
  0x9c   : > { %v408_v7 = vsel %vm379_vm0, %v404_v6, -inf }
  0x9d   : > { %409 = vmax.xlane.f32.xlu0 %v408_v7 }
  0xa1   : > { %v405_v8 = vpop.f32.mrf.mxu0 }
 0x110   : > { %v410_v12 = vpop.xlane.xlu0 %409 }
 0x111   : > { %v411_v13 = vmax.f32 %v407_v11, %v410_v12 }
 0x113   : > { %v412_v14 = vsub.f32 %v407_v11, %v411_v13  ;;  %462 = vst.msk [vmem:[#allocation2] sm:$0xff] %vm376_vm1, %v411_v13  ;;  %417 = vperm.xlu0 %697, %v411_v13  }
 0x115   : > { %v413_v23 = vmul.f32 1.442695, %v412_v14 }
 0x185   : > { %v418_v17 = vpop.permute.xlu0 %417 }
 0x186   : > { %v420_v18 = vsub.f32 %v404_v6, %v418_v17 }
 0x188   : > { %v421_v19 = vmul.f32 1.442695, %v420_v18 }
 0x18a   : > { %701 = vpow2.f32 %v421_v19 }
 0x18b   : > { %703 = vpow2.f32 %v413_v23 }
 0x190   : > { %v702_v20 = vpop.eup %701 }
 0x191   : > { %v425_v21 = vsel %vm379_vm0, %v702_v20, 0.0  ;;  %v438_v22 = vpack.c.bf16 %v702_v20, %v702_v20  ;;  %v704_v24 = vpop.eup %703 }
 0x192   : > { %426 = vadd.xlane.f32.xlu1 %v425_v21  ;;  %v424_v26 = vmul.f32 %v704_v24, %v423_v25 }
 0x193   : > { %651 = vmatmul.msk.bf16.vlgmr.msra.gmra.mxu1 %vm379_vm0, %v438_v22 }
 0x1ab   : > { %434 = vperm.xlu1 %698, %v704_v24  }
 0x205   : > { %v427_v27 = vpop.xlane.xlu1 %426 }
 0x206   : > { %v428_v28 = vadd.f32 %v427_v27, %v424_v26 }
 0x208   : > { %430 = vst.msk [vmem:[#allocation3] sm:$0xff] %vm376_vm1, %v428_v28 }
 0x20f   : > { %v467_v29 = vld [vmem:[#allocation3] sm:$0xff] }
 0x210   : > { %v456_v30 = vpop.f32.mrf.mxu1  ;;  %705 = vrcp.f32 %v467_v29 }
 0x216   : > { %v706_v31 = vpop.eup %705 }
 0x217   : > { %471 = vperm.xlu2 %699, %v706_v31  }
 0x218   : > { %v458_v32 = vpop.f32.mrf.mxu1 }
 0x21d   : > { %v435_v34 = vpop.permute.xlu1 %434 }
 0x21e   : > { %v437_v35 = vmul.f32 %v435_v34, %v431_v33 }
 0x220   : > { %v460_v36 = vadd.f32 %v456_v30, %v437_v35 }
 0x222   : > { %461 = vst.msk [vmem:[#allocation4] sm:$0xff] %vm379_vm0, %v460_v36 }
 0x229   : > { %v466_v37 = vld [vmem:[#allocation4] sm:$0xff] }
 0x271   : > { %v472_v38 = vpop.permute.xlu2 %471 }
 0x272   : > { %v474_v39 = vmul.f32 %v472_v38, %v466_v37 }
 0x274   : > { %v475_v40 = vpack.c.bf16 %v474_v39, %v474_v39 }
 0x276   : > { %477 = vst.msk [vmem:[%s370_s13] sm:$0xf] %vm476_vm3, %v475_v40 }
 0x277 PF: > { %s14_s19 = sadd.s32 1, %s745_s19   ;;  %s857_s15 = smov %s737_s17 }
 0x278   : > { %p11_p7 = scmp.ge.s32.totalorder %s14_s19, 10   ;;  %s858_s16 = smov %s741_s18 }
 0x279   : > { %s859_s17 = smov %s862_s20  ;;  %s860_s18 = smov %s866_s21 }
 0x27a   :  { %13 = sbr.rel (!%p11_p7) target bundleno = 3 (0x3), region = 83 }

// kernel: mlm_with_regression_head.10
= control target key start
LH: loop header
LB: loop body
LE: loop exit
PB: predicated region body
PF: predicated region fallthrough
CT: control target
= control target key end

     0   :  { %vm28_vm0 = vcmask 261120   ;;  %v189_v1 = vmov 0.0   ;;  %v190_v21 = vmov 32.0   ;;  %s267_s1 = inlined_call_operand.vmem [shape: bf16[32,32], index: 1, kind: input, shape index: {}]   ;;  %s268_s0 = inlined_call_operand.vmem [shape: bf16[16,32], index: 0, kind: input, shape index: {}]   ;;  %s269_s2 = inlined_call_operand.vmem [shape: f32[1,32], index: 2, kind: input, shape index: {}]   ;;  %s270_s3 = inlined_call_operand.vmem [shape: f32[16,32], index: 3, kind: input, shape index: {}]   ;;  %s271_s4 = inlined_call_operand.vmem [shape: f32[1,32], index: 4, kind: input, shape index: {}]   ;;  %s272_s5 = inlined_call_operand.vmem [shape: f32[1,32], index: 5, kind: input, shape index: {}]   ;;  %s273_s6 = inlined_call_operand.vmem [shape: f32[16,32], index: 6, kind: output, shape index: {}]  }
   0x1   :  { %v177_v0 = vld [vmem:[%s267_s1 + $0x8] sm:$0xff]  ;;  %29 = vst.msk [vmem:[#allocation2] sm:$0xff] %vm28_vm0, %v189_v1  ;;  %v176_v2 = vld [vmem:[%s267_s1] sm:$0xff]  ;;  %183 = vrcp.f32 %v190_v21 }
   0x2   :  { %30 = vst.msk [vmem:[#allocation2 + $0x8] sm:$0xff] %vm28_vm0, %v189_v1  ;;  %66 = vmatpush.bf16.msra.mxu0 %v177_v0  ;;  %v175_v3 = vld [vmem:[%s268_s0] sm:$0xff]  ;;  %v90_v17 = vld [vmem:[%s270_s3 + $0x8] sm:$0xff] }
   0x3   :  { %v180_v8 = vld [vmem:[%s269_s2] ss:$0 sm:$0xff] }
   0x4   :  { %v89_v12 = vld [vmem:[%s270_s3] sm:$0xff] }
   0x5   :  { %v181_v52 = vld [vmem:[%s271_s4] ss:$0 sm:$0xff] }
   0x6   :  { %67 = vmatpush.bf16.msra.mxu0 %v176_v2  ;;  %v182_v55 = vld [vmem:[%s272_s5] ss:$0 sm:$0xff] }
   0x7   :  { %v184_v22 = vpop.eup %183 }
   0x8   :  { %v31_v4 = vld [vmem:[#allocation2] sm:$0xff]  ;;  %v100_v23 = vmul.f32 32.0, %v184_v22  ;;  %vm104_vm1 = vweird.f32 %v184_v22 }
   0x9   :  { %174 = vmatmul.msk.bf16.vlgmr.msra.gmra.mxu0 %vm28_vm0, %v175_v3  ;;  %v32_v7 = vld [vmem:[#allocation2 + $0x8] sm:$0xff] }
   0xa   :  { %v101_v24 = vsub.f32 1.0, %v100_v23 }
   0xc   :  { %v102_v25 = vmul.f32 %v184_v22, %v101_v24 }
   0xe   :  { %v103_v26 = vadd.f32 %v184_v22, %v102_v25 }
  0x10   :  { %v105_v27 = vsel %vm104_vm1, %v184_v22, %v103_v26 }
  0x86   :  { %v69_v5 = vpop.f32.mrf.mxu0 }
  0x87   :  { %v74_v6 = vadd.f32 %v69_v5, %v31_v4 }
  0x89   :  { %76 = vst.msk [vmem:[#allocation2] sm:$0xff] %vm28_vm0, %v74_v6 }
  0x8e   :  { %v71_v9 = vpop.f32.mrf.mxu0 }
  0x8f   :  { %v75_v10 = vadd.f32 %v71_v9, %v32_v7 }
  0x90   :  { %v81_v11 = vld [vmem:[#allocation2] sm:$0xff] }
  0x91   :  { %77 = vst.msk [vmem:[#allocation2 + $0x8] sm:$0xff] %vm28_vm0, %v75_v10  ;;  %v87_v13 = vadd.f32 %v180_v8, %v81_v11 }
  0x93   :  { %v91_v14 = vadd.f32 %v89_v12, %v87_v13 }
  0x95   :  { %v93_v15 = vsel %vm28_vm0, %v91_v14, 0.0 }
  0x96   :  { %94 = vadd.xlane.f32.xlu0 %v93_v15 }
  0x98   :  { %v82_v16 = vld [vmem:[#allocation2 + $0x8] sm:$0xff] }
  0x99   :  { %v88_v18 = vadd.f32 %v180_v8, %v82_v16 }
  0x9b   :  { %v92_v19 = vadd.f32 %v90_v17, %v88_v18 }
  0x9d   :  { %v96_v20 = vsel %vm28_vm0, %v92_v19, 0.0 }
  0x9e   :  { %97 = vadd.xlane.f32.xlu0 %v96_v20 }
 0x109   :  { %v95_v28 = vpop.xlane.xlu0 %94 }
 0x10a   :  { %v106_v29 = vmul.f32 %v105_v27, %v95_v28 }
 0x10c   :  { %v108_v30 = vsub.f32 %v91_v14, %v106_v29 }
 0x10e   :  { %v110_v31 = vmul.f32 %v108_v30, %v108_v30 }
 0x110   :  { %v112_v32 = vsel %vm28_vm0, %v110_v31, 0.0 }
 0x111   :  { %113 = vadd.xlane.f32.xlu1 %v112_v32  ;;  %v98_v33 = vpop.xlane.xlu0 %97 }
 0x112   :  { %v107_v34 = vmul.f32 %v105_v27, %v98_v33 }
 0x114   :  { %v109_v35 = vsub.f32 %v92_v19, %v107_v34 }
 0x116   :  { %v111_v36 = vmul.f32 %v109_v35, %v109_v35 }
 0x118   :  { %v115_v37 = vsel %vm28_vm0, %v111_v36, 0.0 }
 0x119   :  { %116 = vadd.xlane.f32.xlu1 %v115_v37 }
 0x184   :  { %v114_v38 = vpop.xlane.xlu1 %113 }
 0x185   :  { %v118_v39 = vmul.f32 %v114_v38, %v105_v27 }
 0x187   :  { %v120_v40 = vadd.f32 1e-12, %v118_v39 }
 0x189   :  { %185 = vrsqrt.f32 %v120_v40  ;;  %vm128_vm3 = vweird.f32 %v120_v40 }
 0x18c   :  { %v117_v41 = vpop.xlane.xlu1 %116 }
 0x18d   :  { %v119_v42 = vmul.f32 %v117_v41, %v105_v27 }
 0x18f   :  { %v186_v43 = vpop.eup %185  ;;  %v121_v44 = vadd.f32 1e-12, %v119_v42 }
 0x190   :  { %v123_v45 = vmul.f32 %v186_v43, %v120_v40  ;;  %vm129_vm2 = vweird.f32 %v186_v43 }
 0x191   :  { %187 = vrsqrt.f32 %v121_v44  ;;  %vm130_vm4 = vmor %vm128_vm3, %vm129_vm2  ;;  %vm138_vm6 = vweird.f32 %v121_v44 }
 0x192   :  { %v124_v46 = vmul.f32 %v186_v43, %v123_v45 }
 0x194   :  { %v125_v47 = vmul.f32 0.5, %v124_v46 }
 0x196   :  { %v126_v48 = vsub.f32 1.5, %v125_v47 }
 0x197   :  { %v188_v49 = vpop.eup %187 }
 0x198   :  { %v127_v50 = vmul.f32 %v186_v43, %v126_v48  ;;  %v133_v51 = vmul.f32 %v188_v49, %v121_v44  ;;  %vm139_vm5 = vweird.f32 %v188_v49 }
 0x199   :  { %vm140_vm7 = vmor %vm138_vm6, %vm139_vm5 }
 0x19a   :  { %v131_v53 = vsel %vm130_vm4, %v186_v43, %v127_v50  ;;  %v134_v54 = vmul.f32 %v188_v49, %v133_v51 }
 0x19b   :  { %v142_v56 = vmul.f32 %v131_v53, %v108_v30 }
 0x19c   :  { %v135_v57 = vmul.f32 0.5, %v134_v54 }
 0x19d   :  { %v148_v58 = vmul.f32 %v181_v52, %v142_v56 }
 0x19e   :  { %v136_v59 = vsub.f32 1.5, %v135_v57 }
 0x19f   :  { %v154_v60 = vadd.f32 %v182_v55, %v148_v58 }
 0x1a0   :  { %v137_v61 = vmul.f32 %v188_v49, %v136_v59 }
 0x1a1   :  { %156 = vst.msk [vmem:[%s273_s6] sm:$0xff] %vm28_vm0, %v154_v60 }
 0x1a2   :  { %v141_v62 = vsel %vm140_vm7, %v188_v49, %v137_v61 }
 0x1a3   :  { %v143_v63 = vmul.f32 %v141_v62, %v109_v35 }
 0x1a5   :  { %v149_v0 = vmul.f32 %v181_v52, %v143_v63 }
 0x1a7   :  { %v155_v1 = vadd.f32 %v182_v55, %v149_v0 }
 0x1a9   :  { %157 = vst.msk [vmem:[%s273_s6 + $0x8] sm:$0xff] %vm28_vm0, %v155_v1 }

// kernel: mlm_with_regression_head.11
= control target key start
LH: loop header
LB: loop body
LE: loop exit
PB: predicated region body
PF: predicated region fallthrough
CT: control target
= control target key end

     0   :  { %vm19_vm0 = vcmask 523264   ;;  %v121_v1 = vmov 0.0   ;;  %vm43_vm1 = vcmask 261120   ;;  %vm97_vm2 = vcmask 519168   ;;  %s167_s1 = inlined_call_operand.vmem [shape: bf16[32,64], index: 1, kind: input, shape index: {}]   ;;  %s168_s0 = inlined_call_operand.vmem [shape: f32[16,32], index: 0, kind: input, shape index: {}]   ;;  %s169_s2 = inlined_call_operand.vmem [shape: f32[1,64], index: 2, kind: input, shape index: {}]   ;;  %s170_s3 = inlined_call_operand.vmem [shape: bf16[16,64], index: 3, kind: output, shape index: {}]  }
   0x1   :  { %v114_v0 = vld [vmem:[%s167_s1 + $0x8] sm:$0xff]  ;;  %20 = vst.msk [vmem:[#allocation2] sm:$0xff] %vm19_vm0, %v121_v1  ;;  %v113_v2 = vld [vmem:[%s167_s1] sm:$0xff] }
   0x2   :  { %21 = vst.msk [vmem:[#allocation2 + $0x8] sm:$0xff] %vm19_vm0, %v121_v1  ;;  %53 = vmatpush.bf16.msra.mxu0 %v114_v0  ;;  %v24_v3 = vld [vmem:[%s168_s0] sm:$0xff]  ;;  %v25_v4 = vld [vmem:[%s168_s0 + $0x8] sm:$0xff] }
   0x3   :  { %v26_v5 = vpack.c.bf16 %v25_v4, %v24_v3  ;;  %v116_v10 = vld [vmem:[%s169_s2] ss:$0 sm:$0xff] }
   0x6   :  { %54 = vmatpush.bf16.msra.mxu0 %v113_v2 }
   0x8   :  { %v22_v6 = vld [vmem:[#allocation2] sm:$0xff] }
   0x9   :  { %112 = vmatmul.msk.bf16.vlgmr.msra.gmra.mxu0 %vm43_vm1, %v26_v5  ;;  %v23_v9 = vld [vmem:[#allocation2 + $0x8] sm:$0xff] }
  0x86   :  { %v56_v7 = vpop.f32.mrf.mxu0 }
  0x87   :  { %v61_v8 = vadd.f32 %v56_v7, %v22_v6 }
  0x89   :  { %64 = vst.msk [vmem:[#allocation2] sm:$0xff] %vm19_vm0, %v61_v8 }
  0x8e   :  { %v58_v11 = vpop.f32.mrf.mxu0 }
  0x8f   :  { %v62_v12 = vadd.f32 %v58_v11, %v23_v9 }
  0x90   :  { %v69_v13 = vld [vmem:[#allocation2] sm:$0xff] }
  0x91   :  { %v75_v14 = vadd.f32 %v116_v10, %v69_v13  ;;  %65 = vst.msk [vmem:[#allocation2 + $0x8] sm:$0xff] %vm19_vm0, %v62_v12 }
  0x93   :  { %v77_v15 = vmul.f32 %v75_v14, %v75_v14 }
  0x95   :  { %v79_v16 = vmul.f32 %v77_v15, %v75_v14 }
  0x97   :  { %v81_v17 = vmul.f32 0.044715, %v79_v16 }
  0x98   :  { %v70_v18 = vld [vmem:[#allocation2 + $0x8] sm:$0xff] }
  0x99   :  { %v83_v19 = vadd.f32 %v81_v17, %v75_v14  ;;  %v76_v20 = vadd.f32 %v116_v10, %v70_v18 }
  0x9b   :  { %v85_v21 = vmul.f32 0.7978846, %v83_v19  ;;  %v78_v22 = vmul.f32 %v76_v20, %v76_v20 }
  0x9d   :  { %117 = vtanh.f32 %v85_v21  ;;  %v80_v23 = vmul.f32 %v78_v22, %v76_v20 }
  0x9f   :  { %v82_v24 = vmul.f32 0.044715, %v80_v23 }
  0xa1   :  { %v84_v25 = vadd.f32 %v82_v24, %v76_v20 }
  0xa3   :  { %v118_v26 = vpop.eup %117  ;;  %v86_v27 = vmul.f32 0.7978846, %v84_v25 }
  0xa4   :  { %v89_v28 = vadd.f32 1.0, %v118_v26 }
  0xa5   :  { %119 = vtanh.f32 %v86_v27 }
  0xa6   :  { %v91_v29 = vmul.f32 0.5, %v89_v28 }
  0xa8   :  { %v93_v30 = vmul.f32 %v91_v29, %v75_v14 }
  0xaa   :  { %v95_v31 = vpack.c.bf16 %v93_v30, %v93_v30 }
  0xab   :  { %v120_v32 = vpop.eup %119 }
  0xac   :  { %98 = vst.msk [vmem:[%s170_s3] sm:$0xf] %vm97_vm2, %v95_v31  ;;  %v90_v33 = vadd.f32 1.0, %v120_v32 }
  0xae   :  { %v92_v34 = vmul.f32 0.5, %v90_v33 }
  0xb0   :  { %v94_v35 = vmul.f32 %v92_v34, %v76_v20 }
  0xb2   :  { %v96_v36 = vpack.c.bf16 %v94_v35, %v94_v35 }
  0xb4   :  { %99 = vst.msk [vmem:[%s170_s3 + $0x4] sm:$0xf] %vm97_vm2, %v96_v36 }

// kernel: mlm_with_regression_head.12
= control target key start
LH: loop header
LB: loop body
LE: loop exit
PB: predicated region body
PF: predicated region fallthrough
CT: control target
= control target key end

     0   :  { %vm28_vm0 = vcmask 261120   ;;  %v216_v1 = vmov 0.0   ;;  %vm72_vm1 = vcmask 523264   ;;  %v217_v23 = vmov 32.0   ;;  %s299_s1 = inlined_call_operand.vmem [shape: bf16[64,32], index: 1, kind: input, shape index: {}]   ;;  %s300_s0 = inlined_call_operand.vmem [shape: bf16[16,64], index: 0, kind: input, shape index: {}]   ;;  %s301_s2 = inlined_call_operand.vmem [shape: f32[1,32], index: 2, kind: input, shape index: {}]   ;;  %s302_s3 = inlined_call_operand.vmem [shape: f32[16,32], index: 3, kind: input, shape index: {}]   ;;  %s303_s4 = inlined_call_operand.vmem [shape: f32[1,32], index: 4, kind: input, shape index: {}]   ;;  %s304_s5 = inlined_call_operand.vmem [shape: f32[1,32], index: 5, kind: input, shape index: {}]   ;;  %s305_s6 = inlined_call_operand.vmem [shape: f32[16,32], index: 6, kind: output, shape index: {}]  }
   0x1   :  { %v204_v0 = vld [vmem:[%s299_s1 + $0x18] sm:$0xff]  ;;  %29 = vst.msk [vmem:[#allocation2] sm:$0xff] %vm28_vm0, %v216_v1  ;;  %v203_v2 = vld [vmem:[%s299_s1 + $0x10] sm:$0xff]  ;;  %v202_v3 = vld [vmem:[%s299_s1 + $0x8] sm:$0xff]  ;;  %210 = vrcp.f32 %v217_v23 }
   0x2   :  { %30 = vst.msk [vmem:[#allocation2 + $0x8] sm:$0xff] %vm28_vm0, %v216_v1  ;;  %80 = vmatpush.bf16.msra.mxu0 %v204_v0  ;;  %v201_v4 = vld [vmem:[%s299_s1] sm:$0xff]  ;;  %v107_v19 = vld [vmem:[%s302_s3 + $0x8] sm:$0xff] }
   0x3   :  { %v200_v5 = vld [vmem:[%s300_s0] sm:$0xff] }
   0x4   :  { %v207_v10 = vld [vmem:[%s301_s2] ss:$0 sm:$0xff] }
   0x5   :  { %v106_v14 = vld [vmem:[%s302_s3] sm:$0xff] }
   0x6   :  { %81 = vmatpush.bf16.msra.mxu0 %v203_v2  ;;  %v208_v54 = vld [vmem:[%s303_s4] ss:$0 sm:$0xff] }
   0x7   :  { %v211_v24 = vpop.eup %210  ;;  %v209_v57 = vld [vmem:[%s304_s5] ss:$0 sm:$0xff] }
   0x8   :  { %v31_v6 = vld [vmem:[#allocation2] sm:$0xff]  ;;  %v117_v25 = vmul.f32 32.0, %v211_v24  ;;  %vm121_vm2 = vweird.f32 %v211_v24 }
   0x9   :  { %v32_v9 = vld [vmem:[#allocation2 + $0x8] sm:$0xff] }
   0xa   :  { %82 = vmatpush.bf16.msra.mxu0 %v202_v3  ;;  %v118_v26 = vsub.f32 1.0, %v117_v25 }
   0xc   :  { %v119_v27 = vmul.f32 %v211_v24, %v118_v26 }
   0xe   :  { %83 = vmatpush.bf16.msra.mxu0 %v201_v4  ;;  %v120_v28 = vadd.f32 %v211_v24, %v119_v27 }
  0x10   :  { %v122_v29 = vsel %vm121_vm2, %v211_v24, %v120_v28 }
  0x11   :  { %199 = vmatmul.msk.bf16.vlgmr.msra.gmra.mxu0 %vm72_vm1, %v200_v5 }
  0x8e   :  { %v85_v7 = vpop.f32.mrf.mxu0 }
  0x8f   :  { %v90_v8 = vadd.f32 %v85_v7, %v31_v6 }
  0x91   :  { %93 = vst.msk [vmem:[#allocation2] sm:$0xff] %vm28_vm0, %v90_v8 }
  0x96   :  { %v87_v11 = vpop.f32.mrf.mxu0 }
  0x97   :  { %v91_v12 = vadd.f32 %v87_v11, %v32_v9 }
  0x98   :  { %v98_v13 = vld [vmem:[#allocation2] sm:$0xff] }
  0x99   :  { %94 = vst.msk [vmem:[#allocation2 + $0x8] sm:$0xff] %vm28_vm0, %v91_v12  ;;  %v104_v15 = vadd.f32 %v207_v10, %v98_v13 }
  0x9b   :  { %v108_v16 = vadd.f32 %v106_v14, %v104_v15 }
  0x9d   :  { %v110_v17 = vsel %vm28_vm0, %v108_v16, 0.0 }
  0x9e   :  { %111 = vadd.xlane.f32.xlu0 %v110_v17 }
  0xa0   :  { %v99_v18 = vld [vmem:[#allocation2 + $0x8] sm:$0xff] }
  0xa1   :  { %v105_v20 = vadd.f32 %v207_v10, %v99_v18 }
  0xa3   :  { %v109_v21 = vadd.f32 %v107_v19, %v105_v20 }
  0xa5   :  { %v113_v22 = vsel %vm28_vm0, %v109_v21, 0.0 }
  0xa6   :  { %114 = vadd.xlane.f32.xlu0 %v113_v22 }
 0x111   :  { %v112_v30 = vpop.xlane.xlu0 %111 }
 0x112   :  { %v123_v31 = vmul.f32 %v122_v29, %v112_v30 }
 0x114   :  { %v125_v32 = vsub.f32 %v108_v16, %v123_v31 }
 0x116   :  { %v127_v33 = vmul.f32 %v125_v32, %v125_v32 }
 0x118   :  { %v129_v34 = vsel %vm28_vm0, %v127_v33, 0.0 }
 0x119   :  { %130 = vadd.xlane.f32.xlu1 %v129_v34  ;;  %v115_v35 = vpop.xlane.xlu0 %114 }
 0x11a   :  { %v124_v36 = vmul.f32 %v122_v29, %v115_v35 }
 0x11c   :  { %v126_v37 = vsub.f32 %v109_v21, %v124_v36 }
 0x11e   :  { %v128_v38 = vmul.f32 %v126_v37, %v126_v37 }
 0x120   :  { %v132_v39 = vsel %vm28_vm0, %v128_v38, 0.0 }
 0x121   :  { %133 = vadd.xlane.f32.xlu1 %v132_v39 }
 0x18c   :  { %v131_v40 = vpop.xlane.xlu1 %130 }
 0x18d   :  { %v135_v41 = vmul.f32 %v131_v40, %v122_v29 }
 0x18f   :  { %v137_v42 = vadd.f32 1e-12, %v135_v41 }
 0x191   :  { %212 = vrsqrt.f32 %v137_v42  ;;  %vm145_vm4 = vweird.f32 %v137_v42 }
 0x194   :  { %v134_v43 = vpop.xlane.xlu1 %133 }
 0x195   :  { %v136_v44 = vmul.f32 %v134_v43, %v122_v29 }
 0x197   :  { %v213_v45 = vpop.eup %212  ;;  %v138_v46 = vadd.f32 1e-12, %v136_v44 }
 0x198   :  { %v140_v47 = vmul.f32 %v213_v45, %v137_v42  ;;  %vm146_vm3 = vweird.f32 %v213_v45 }
 0x199   :  { %214 = vrsqrt.f32 %v138_v46  ;;  %vm147_vm5 = vmor %vm145_vm4, %vm146_vm3  ;;  %vm155_vm7 = vweird.f32 %v138_v46 }
 0x19a   :  { %v141_v48 = vmul.f32 %v213_v45, %v140_v47 }
 0x19c   :  { %v142_v49 = vmul.f32 0.5, %v141_v48 }
 0x19e   :  { %v143_v50 = vsub.f32 1.5, %v142_v49 }
 0x19f   :  { %v215_v51 = vpop.eup %214 }
 0x1a0   :  { %v144_v52 = vmul.f32 %v213_v45, %v143_v50  ;;  %v150_v53 = vmul.f32 %v215_v51, %v138_v46  ;;  %vm156_vm6 = vweird.f32 %v215_v51 }
 0x1a1   :  { %vm157_vm8 = vmor %vm155_vm7, %vm156_vm6 }
 0x1a2   :  { %v148_v55 = vsel %vm147_vm5, %v213_v45, %v144_v52  ;;  %v151_v56 = vmul.f32 %v215_v51, %v150_v53 }
 0x1a3   :  { %v159_v58 = vmul.f32 %v148_v55, %v125_v32 }
 0x1a4   :  { %v152_v59 = vmul.f32 0.5, %v151_v56 }
 0x1a5   :  { %v165_v60 = vmul.f32 %v208_v54, %v159_v58 }
 0x1a6   :  { %v153_v61 = vsub.f32 1.5, %v152_v59 }
 0x1a7   :  { %v171_v62 = vadd.f32 %v209_v57, %v165_v60 }
 0x1a8   :  { %v154_v63 = vmul.f32 %v215_v51, %v153_v61 }
 0x1a9   :  { %173 = vst.msk [vmem:[%s305_s6] sm:$0xff] %vm28_vm0, %v171_v62 }
 0x1aa   :  { %v158_v0 = vsel %vm157_vm8, %v215_v51, %v154_v63 }
 0x1ab   :  { %v160_v1 = vmul.f32 %v158_v0, %v126_v37 }
 0x1ad   :  { %v166_v2 = vmul.f32 %v208_v54, %v160_v1 }
 0x1af   :  { %v172_v3 = vadd.f32 %v209_v57, %v166_v2 }
 0x1b1   :  { %174 = vst.msk [vmem:[%s305_s6 + $0x8] sm:$0xff] %vm28_vm0, %v172_v3 }

// kernel: mlm_with_regression_head.13
= control target key start
LH: loop header
LB: loop body
LE: loop exit
PB: predicated region body
PF: predicated region fallthrough
CT: control target
= control target key end

     0   :  { %vm53_vm0 = vcmask 261120   ;;  %s467_s1 = inlined_call_operand.vmem [shape: bf16[32,256], index: 1, kind: input, shape index: {}]   ;;  %s468_s0 = inlined_call_operand.vmem [shape: f32[2,32], index: 0, kind: input, shape index: {}]   ;;  %s469_s3 = inlined_call_operand.vmem [shape: bf16[256,128], index: 3, kind: input, shape index: {}]   ;;  %s470_s4 = inlined_call_operand.vmem [shape: f32[1,128], index: 4, kind: input, shape index: {}]   ;;  %s471_s2 = inlined_call_operand.vmem [shape: f32[1,256], index: 2, kind: input, shape index: {}]   ;;  %s472_s5 = inlined_call_operand.vmem [shape: f32[2,128], index: 5, kind: output, shape index: {}]  }
   0x1   :  { %v260_v0 = vld [vmem:[%s467_s1 + $0x10] sm:$0xf]  ;;  %v335_v1 = vld [vmem:[%s467_s1 + $0x14] sm:$0xf0]  ;;  %v334_v2 = vld [vmem:[%s467_s1 + $0x14] sm:$0xf] }
   0x2   :  { %v261_v3 = vor.u32 %v335_v1, %v260_v0  ;;  %v262_v4 = vld [vmem:[%s467_s1 + $0x18] sm:$0xf0]  ;;  %v252_v5 = vld [vmem:[%s467_s1] sm:$0xf]  ;;  %v333_v6 = vld [vmem:[%s467_s1 + $0x4] sm:$0xf0] }
   0x3   :  { %v265_v7 = vor.u32 %v334_v2, %v262_v4  ;;  %v332_v8 = vld [vmem:[%s467_s1 + $0x4] sm:$0xf]  ;;  %v254_v9 = vld [vmem:[%s467_s1 + $0x8] sm:$0xf0]  ;;  %v253_v10 = vor.u32 %v333_v6, %v252_v5  ;;  %v21_v11 = vld [vmem:[%s468_s0] sm:$0x3] }
   0x4   :  { %63 = vmatpush.bf16.msra.mxu0 %v261_v3  ;;  %v343_v12 = vld [vmem:[%s469_s3 + $0x38] sm:$0xff]  ;;  %v257_v14 = vor.u32 %v332_v8, %v254_v9  ;;  %v342_v15 = vld [vmem:[%s469_s3 + $0x30] sm:$0xff]  ;;  %v22_v17 = vpack.c.bf16 %v21_v11, %v21_v11  ;;  %v341_v18 = vld [vmem:[%s469_s3 + $0x28] sm:$0xff] }
   0x5   :  { %v351_v13 = vld [vmem:[%s469_s3 + $0x78] sm:$0xff]  ;;  %76 = vmatpush.bf16.msra.mxu1 %v265_v7  ;;  %219 = vmatpush.bf16.msra.mxu2 %v343_v12  ;;  %v350_v16 = vld [vmem:[%s469_s3 + $0x70] sm:$0xff]  ;;  %v349_v19 = vld [vmem:[%s469_s3 + $0x68] sm:$0xff] }
   0x6   :  { %232 = vmatpush.bf16.msra.mxu3 %v351_v13  ;;  %v340_v20 = vld [vmem:[%s469_s3 + $0x20] sm:$0xff]  ;;  %v339_v22 = vld [vmem:[%s469_s3 + $0x18] sm:$0xff]  ;;  %v338_v24 = vld [vmem:[%s469_s3 + $0x10] sm:$0xff] }
   0x7   :  { %v348_v21 = vld [vmem:[%s469_s3 + $0x60] sm:$0xff]  ;;  %v347_v23 = vld [vmem:[%s469_s3 + $0x58] sm:$0xff]  ;;  %v346_v25 = vld [vmem:[%s469_s3 + $0x50] sm:$0xff] }
   0x8   :  { %64 = vmatpush.bf16.msra.mxu0 %v253_v10  ;;  %v337_v26 = vld [vmem:[%s469_s3 + $0x8] sm:$0xff]  ;;  %v336_v28 = vld [vmem:[%s469_s3] sm:$0xff] }
   0x9   :  { %77 = vmatpush.bf16.msra.mxu1 %v257_v14  ;;  %220 = vmatpush.bf16.msra.mxu2 %v342_v15  ;;  %v345_v27 = vld [vmem:[%s469_s3 + $0x48] sm:$0xff]  ;;  %v344_v29 = vld [vmem:[%s469_s3 + $0x40] sm:$0xff] }
   0xa   :  { %233 = vmatpush.bf16.msra.mxu3 %v350_v16  ;;  %v27_v30 = vld [vmem:[%s471_s2] sm:$0x3] }
   0xb   :  { %266 = vmatmul.msk.bf16.vlgmr.msra.gmra.mxu0 %vm53_vm0, %v22_v17  ;;  %v29_v31 = vperm.slane %v27_v30, 0  ;;  %v30_v32 = vperm.slane %v27_v30, 1  ;;  %v352_v43 = vld [vmem:[%s470_s4] ss:$0 sm:$0xff] }
   0xc   :  { %267 = vmatmul.msk.bf16.vlgmr.msra.gmra.mxu1 %vm53_vm0, %v22_v17 }
   0xd   :  { %221 = vmatpush.bf16.msra.mxu2 %v341_v18 }
   0xe   :  { %234 = vmatpush.bf16.msra.mxu3 %v349_v19 }
  0x11   :  { %222 = vmatpush.bf16.msra.mxu2 %v340_v20 }
  0x12   :  { %235 = vmatpush.bf16.msra.mxu3 %v348_v21 }
  0x15   :  { %223 = vmatpush.bf16.msra.mxu2 %v339_v22 }
  0x16   :  { %236 = vmatpush.bf16.msra.mxu3 %v347_v23 }
  0x19   :  { %224 = vmatpush.bf16.msra.mxu2 %v338_v24 }
  0x1a   :  { %237 = vmatpush.bf16.msra.mxu3 %v346_v25 }
  0x1d   :  { %225 = vmatpush.bf16.msra.mxu2 %v337_v26 }
  0x1e   :  { %238 = vmatpush.bf16.msra.mxu3 %v345_v27 }
  0x21   :  { %226 = vmatpush.bf16.msra.mxu2 %v336_v28 }
  0x22   :  { %239 = vmatpush.bf16.msra.mxu3 %v344_v29 }
  0x88   :  { %v66_v33 = vpop.f32.mrf.mxu0 }
  0x89   :  { %v67_v34 = vadd.f32 %v66_v33, %v29_v31  ;;  %v79_v35 = vpop.f32.mrf.mxu1 }
  0x8a   :  { %v80_v36 = vadd.f32 %v79_v35, %v30_v32 }
  0x8b   :  { %v83_v37 = vmax.f32 %v67_v34, 0.0 }
  0x8c   :  { %v84_v38 = vmax.f32 %v80_v36, 0.0 }
  0x8d   :  { %v85_v39 = vpack.c.bf16 %v83_v37, %v83_v37 }
  0x8e   :  { %v86_v40 = vpack.c.bf16 %v84_v38, %v84_v38 }
  0x8f   :  { %227 = vmatmul.bf16.vlgmr.msra.gmra.mxu2 %v85_v39 }
  0x90   :  { %240 = vmatmul.bf16.vlgmr.msra.gmra.mxu3 %v86_v40  ;;  %v68_v41 = vpop.f32.mrf.mxu0 }
  0x91   :  { %v81_v42 = vpop.f32.mrf.mxu1 }
 0x112   :  { %v228_v44 = vpop.f32.mrf.mxu2 }
 0x113   :  { %v229_v45 = vadd.f32 %v352_v43, %v228_v44  ;;  %v241_v46 = vpop.f32.mrf.mxu3 }
 0x115   :  { %v242_v47 = vadd.f32 %v241_v46, %v229_v45 }
 0x117   :  { %245 = vst [vmem:[%s472_s5] sm:$0x3] %v242_v47 }
 0x11a   :  { %v230_v48 = vpop.f32.mrf.mxu2 }
 0x11b   :  { %v243_v49 = vpop.f32.mrf.mxu3 }

</bundles_post_ra>
